<compile_context>
chip_gen: v5e
topology: v5e:2x2
jax: 0.10.0
libtpu: 0.0.40
codegen_flags: <defaults>
</compile_context>

<pallas_src>
import functools

import jax
import jax.numpy as jnp
from jax.experimental import pallas as pl
from jax.experimental.pallas import tpu as pltpu


def _round_up(x, m):
    return (x + m - 1) // m * m


def deepfm_kernel(ids_ref, dense_ref, stk_ref, w1t_ref, w2t_ref, wout_ref,
                  out_ref, z_ref, *, vp, ep, hp, cdtype):
    S, TB = ids_ref.shape            # sparse features x batch tile
    DP = dense_ref.shape[0]          # dense band rows (8-aligned)
    KP = z_ref.shape[0]              # padded contracting dim
    sv = S * vp                      # rows used by the one-hot vocab bands
    ones_off = sv + DP               # z row that is identically 1 (bias fold)
    lin_row = 2 * ep                 # FM-linear row inside the stacked LHS
    dnn_off = 2 * ep + 8             # first DNN row inside the stacked LHS

    # ---- build Z = [banded one-hot(sparse ids) | dense | ones-row | 0] in scratch ----
    ids = ids_ref[...]                                               # (S, TB) int32
    band_iota = jax.lax.broadcasted_iota(jnp.int32, (vp, TB), 0)
    for s in range(S):                                               # static unroll, S tiny
        z_ref[s * vp:(s + 1) * vp, :] = (band_iota == ids[s:s + 1, :]).astype(cdtype)
    z_ref[sv:sv + DP, :] = dense_ref[...].astype(cdtype)
    ones_band = (jax.lax.broadcasted_iota(jnp.int32, (8, TB), 0) == 0).astype(cdtype)
    z_ref[ones_off:ones_off + 8, :] = ones_band
    if KP > ones_off + 8:                                            # static; zero pad rows
        z_ref[ones_off + 8:, :] = jnp.zeros((KP - ones_off - 8, TB), cdtype)
    z = z_ref[...]                                                   # (KP, TB)

    # ---- ONE stacked matmul: [t2^T ; (t2^2)^T ; FM-linear row ; folded W0^T] @ z ----
    r = jnp.dot(stk_ref[...], z, preferred_element_type=jnp.float32)   # (MS, TB) f32
    a = r[0:ep]                          # (EP, TB)  sum_s e_s per embedding dim
    sq = r[ep:2 * ep]                    # (EP, TB)  sum_s e_s^2
    lin = r[lin_row:lin_row + 1]         # (1, TB)   FM linear + dense@lin_w + global bias
    h = r[dnn_off:dnn_off + hp]          # (HP, TB)  DNN layer-0 pre-activation (+ b0)

    # ---- FM second order: 0.5 * sum_e [(sum_s e_s)^2 - sum_s e_s^2] ----
    cross = 0.5 * jnp.sum(a * a - sq, axis=0, keepdims=True)           # (1, TB)

    # ---- DNN: 3 x (Linear + ReLU); dropout p=0.0 -> identity.
    # Biases ride on the always-one row (local row H of h); output is an 8-row matmul.
    h = jnp.maximum(h, 0.0).astype(cdtype)
    h = jnp.maximum(jnp.dot(w1t_ref[...], h, preferred_element_type=jnp.float32),
                    0.0).astype(cdtype)
    h = jnp.maximum(jnp.dot(w2t_ref[...], h, preferred_element_type=jnp.float32),
                    0.0).astype(cdtype)
    dnn = jnp.dot(wout_ref[...], h, preferred_element_type=jnp.float32)[0:1, :]

    # ---- output (lane-dense (1, TB) store) ----
    out_ref[...] = jax.nn.sigmoid(lin + cross + dnn)


def prepare_params(params, *, n_sparse, n_dense, emb_size, hidden, vocab,
                   compute_dtype=jnp.float32):
    """Fold / pad / transpose / stack the weights once (amortized over all batches)."""
    S, D, E, H, V = n_sparse, n_dense, emb_size, hidden, vocab
    VP = _round_up(V, 8)                # per-feature vocab band (8-aligned rows of z)
    DP = _round_up(D, 8)                # dense band rows
    EP = _round_up(E, 8)                # FM embedding rows in the stacked LHS
    HP = _round_up(H + 1, 8)            # hidden rows + 1 "always-one" bias row
    ones_col = S * VP + DP              # column of z that is identically 1
    KP = _round_up(ones_col + 8, 128)   # padded contracting dim
    lin_row = 2 * EP
    dnn_off = 2 * EP + 8
    MS = dnn_off + HP                   # rows of the stacked LHS (multiple of 8)

    f32 = jnp.float32
    t1 = params["emb_table1"].astype(f32).reshape(S * V, 1)
    t2 = params["emb_table2"].astype(f32).reshape(S * V, E)
    lin_w = params["lin_w"].astype(f32)[:, 0]                           # (D,)
    w0 = params["w0"].astype(f32)                                       # (S*E + D, H)
    w1 = params["w1"].astype(f32)
    w2 = params["w2"].astype(f32)
    b0 = params["b0"].astype(f32)[0]
    b1 = params["b1"].astype(f32)[0]
    b2 = params["b2"].astype(f32)[0]
    w_out = params["w_out"].astype(f32)[:, 0]                           # (H,)
    bias = params["bias"].astype(f32).reshape(())                       # scalar

    def band_pad(x):                    # (S*V, X) -> (S*VP, X), vocab bands 8-aligned
        x = x.reshape(S, V, -1)
        x = jnp.pad(x, ((0, 0), (0, VP - V), (0, 0)))
        return x.reshape(S * VP, -1)

    t1b = band_pad(t1)[:, 0]                                            # (S*VP,)
    t2b = band_pad(t2)                                                  # (S*VP, E)

    # Fold embedding table2 into DNN layer-0:  z(one-hot) @ W0_fold == [emb2|dense] @ W0
    w0_sp = w0[:S * E].reshape(S, E, H)
    w0_fold = jnp.einsum("sve,seh->svh",
                         params["emb_table2"].astype(f32), w0_sp).reshape(S * V, H)
    w0b = band_pad(w0_fold)                                             # (S*VP, H)

    # Stacked LHS: [t2^T ; (t2^2)^T ; FM-linear row ; folded W0^T (+b0, +ones row)]
    stk = jnp.zeros((MS, KP), f32)
    stk = stk.at[0:E, 0:S * VP].set(t2b.T)
    stk = stk.at[EP:EP + E, 0:S * VP].set((t2b * t2b).T)
    stk = stk.at[lin_row, 0:S * VP].set(t1b)
    stk = stk.at[lin_row, S * VP:S * VP + D].set(lin_w)
    stk = stk.at[lin_row, ones_col].set(bias)                 # global bias folded in
    stk = stk.at[dnn_off:dnn_off + H, 0:S * VP].set(w0b.T)
    stk = stk.at[dnn_off:dnn_off + H, S * VP:S * VP + D].set(w0[S * E:].T)
    stk = stk.at[dnn_off:dnn_off + H, ones_col].set(b0)       # b0 folded in
    stk = stk.at[dnn_off + H, ones_col].set(1.0)              # propagate the ones row

    # Hidden layers: biases folded via the always-one row (local row H of h).
    w1t = (jnp.zeros((HP, HP), f32)
           .at[:H, :H].set(w1.T).at[:H, H].set(b1).at[H, H].set(1.0))
    w2t = (jnp.zeros((HP, HP), f32)
           .at[:H, :H].set(w2.T).at[:H, H].set(b2).at[H, H].set(1.0))
    wout = jnp.zeros((8, HP), f32).at[0, :H].set(w_out)       # dnn_linear (no bias)

    cd = compute_dtype
    return dict(stk=stk.astype(cd), w1t=w1t.astype(cd), w2t=w2t.astype(cd),
                wout=wout.astype(cd), vp=VP, dp=DP, ep=EP, hp=HP, kp=KP, ms=MS)


def deepfm_forward(X, params, *, n_sparse, n_dense, emb_size, vocab,
                   tile_b=512, compute_dtype=jnp.float32):
    """X: (B, n_sparse + n_dense) float32; first n_sparse columns hold integer ids."""
    B = X.shape[0]
    S, D, E = n_sparse, n_dense, emb_size
    H = params["w1"].shape[0]
    prep = prepare_params(params, n_sparse=S, n_dense=D, emb_size=E, hidden=H,
                          vocab=vocab, compute_dtype=compute_dtype)
    VP, DP, EP, HP, KP, MS = (prep[k] for k in ("vp", "dp", "ep", "hp", "kp", "ms"))

    # Batch tile: as large as possible, but keep >= 2 grid steps (v7x has 2 TCs and
    # the "parallel" batch axis is how work gets sharded) and never exceed the batch.
    tb = min(int(tile_b), max(128, _round_up(B, 128)))
    if B > 128:
        tb = min(tb, max(128, _round_up(pl.cdiv(B, 2), 128)))
    Bp = _round_up(B, tb)

    # Transposed per-batch inputs: batch lives on the lane (last) dim.
    ids_t = X[:, :S].astype(jnp.int32).T                        # (S, B)
    dense_t = X[:, S:S + D].astype(jnp.float32).T               # (D, B)
    ids_t = jnp.pad(ids_t, ((0, 0), (0, Bp - B)))
    dense_t = jnp.pad(dense_t, ((0, DP - D), (0, Bp - B)))      # (DP, Bp)

    grid = (Bp // tb,)
    batch_map = lambda i: (0, i)        # tiled over batch
    const_map = lambda i: (0, 0)        # resident weights (no per-step re-DMA)
    # TODO(synk): add pipeline_mode=pl.Buffered(1) to the const_map specs at
    # production scale to single-buffer the resident weights (halves their VMEM).

    in_specs = [
        pl.BlockSpec((S, tb), batch_map),      # sparse ids
        pl.BlockSpec((DP, tb), batch_map),     # dense features (row-padded)
        pl.BlockSpec((MS, KP), const_map),     # stacked [t2^T; t2sq^T; lin; W0_fold^T]
        pl.BlockSpec((HP, HP), const_map),     # W1^T (+ b1 via ones row)
        pl.BlockSpec((HP, HP), const_map),     # W2^T (+ b2 via ones row)
        pl.BlockSpec((8, HP), const_map),      # dnn_linear weight (8-row padded)
    ]
    out_specs = pl.BlockSpec((1, tb), batch_map)
    scratch_shapes = [pltpu.VMEM((KP, tb), compute_dtype)]      # z build buffer

    # VMEM budget from the actual buffer sizes (weights double-buffered by default).
    bpe = jnp.dtype(compute_dtype).itemsize
    weight_bytes = (MS * KP + 2 * HP * HP + 8 * HP) * bpe * 2
    io_bytes = ((S + DP) * tb * 4 + tb * 4) * 2
    scratch_bytes = KP * tb * bpe
    interm_bytes = (MS + 3 * HP + 32) * tb * 4
    vmem_limit = int(1.5 * (weight_bytes + io_bytes + scratch_bytes + interm_bytes))
    vmem_limit = min(max(vmem_limit + (4 << 20), 16 << 20), 100 << 20)

    kernel = functools.partial(deepfm_kernel, vp=VP, ep=EP, hp=HP,
                               cdtype=compute_dtype)
    out = pl.pallas_call(
        kernel,
        grid=grid,
        in_specs=in_specs,
        out_specs=out_specs,
        out_shape=jax.ShapeDtypeStruct((1, Bp), jnp.float32),
        scratch_shapes=scratch_shapes,
        compiler_params=pltpu.CompilerParams(
            dimension_semantics=("parallel",),
            vmem_limit_bytes=vmem_limit,
        ),
    )(ids_t, dense_t, prep["stk"], prep["w1t"], prep["w2t"], prep["wout"])

    return out[0, :B][:, None]                                  # (B, 1)


def reference_forward(X, params, *, n_sparse, n_dense, emb_size):
    """Pure-JAX reference mirroring the PyTorch forward, for validation."""
    B = X.shape[0]
    idx = X[:, :n_sparse].astype(jnp.int32)
    dense = X[:, n_sparse:].astype(jnp.float32)
    s_ar = jnp.arange(n_sparse)[None, :]
    emb1 = params["emb_table1"][s_ar, idx, 0]
    emb2 = params["emb_table2"][s_ar, idx]

    logit = jnp.sum(emb1, -1, keepdims=True) + dense @ params["lin_w"]
    sum_e = jnp.sum(emb2, axis=1)
    cross = 0.5 * jnp.sum(sum_e ** 2 - jnp.sum(emb2 ** 2, axis=1), -1, keepdims=True)
    logit = logit + cross

    h = jnp.concatenate([emb2.reshape(B, -1), dense], axis=-1)
    h = jnp.maximum(h @ params["w0"] + params["b0"], 0.0)
    h = jnp.maximum(h @ params["w1"] + params["b1"], 0.0)
    h = jnp.maximum(h @ params["w2"] + params["b2"], 0.0)
    logit = logit + h @ params["w_out"]
    return jax.nn.sigmoid(logit + params["bias"][0, 0])


if __name__ == "__main__":
    # Small, DeepFM-consistent shapes; B=1024 with tile_b=512 -> a 2-step batch grid.
    B = 1024        # batch
    S = 6           # number of sparse feature columns
    D = 5           # number of dense feature columns
    V = 10          # vocab size per sparse feature
    E = 4           # embedding_size (default ebedding_size=4)
    H = 32          # dnn hidden width (3 layers, stand-in for [400, 400, 400])
    init_std = 1e-4
    dnn_in_size = S * E + D

    key = jax.random.PRNGKey(0)
    ks = jax.random.split(key, 12)

    params = {
        "emb_table1": init_std * jax.random.normal(ks[0], (S, V, 1), jnp.float32),
        "emb_table2": init_std * jax.random.normal(ks[1], (S, V, E), jnp.float32),
        "lin_w": init_std * jax.random.normal(ks[2], (D, 1), jnp.float32),
        "w0": init_std * jax.random.normal(ks[3], (dnn_in_size, H), jnp.float32),
        "b0": 0.01 * jax.random.normal(ks[4], (1, H), jnp.float32),
        "w1": init_std * jax.random.normal(ks[5], (H, H), jnp.float32),
        "b1": 0.01 * jax.random.normal(ks[6], (1, H), jnp.float32),
        "w2": init_std * jax.random.normal(ks[7], (H, H), jnp.float32),
        "b2": 0.01 * jax.random.normal(ks[8], (1, H), jnp.float32),
        "w_out": init_std * jax.random.normal(ks[9], (H, 1), jnp.float32),
        "bias": jnp.zeros((1, 1), jnp.float32),
    }

    sparse_ids = jax.random.randint(ks[10], (B, S), 0, V).astype(jnp.float32)
    dense_vals = jax.random.normal(ks[11], (B, D), jnp.float32)
    X = jnp.concatenate([sparse_ids, dense_vals], axis=-1)      # (B, S + D)

    y_ref = reference_forward(X, params, n_sparse=S, n_dense=D, emb_size=E)

    # f32 weights: exact path, tight tolerance.
    y = deepfm_forward(X, params, n_sparse=S, n_dense=D, emb_size=E, vocab=V,
                       tile_b=512, compute_dtype=jnp.float32)
    y = jax.block_until_ready(y)
    assert y.shape == (B, 1)
    assert jnp.allclose(y, y_ref, atol=1e-6, rtol=1e-5), \
        float(jnp.max(jnp.abs(y - y_ref)))

    # bf16 weights / z (production-scale option): f32 accumulation, looser tolerance.
    y_bf16 = deepfm_forward(X, params, n_sparse=S, n_dense=D, emb_size=E, vocab=V,
                            tile_b=512, compute_dtype=jnp.bfloat16)
    y_bf16 = jax.block_until_ready(y_bf16)
    assert jnp.allclose(y_bf16, y_ref, atol=1e-3), \
        float(jnp.max(jnp.abs(y_bf16 - y_ref)))

    print("KERNEL_OK")
</pallas_src>

<mosaic_0001>
module attributes {stable_mosaic.version = 11 : i64} {
  func.func @deepfm_kernel(%arg0: i32, %arg1: memref<6x512xi32, #tpu.memory_space<vmem>>, %arg2: memref<8x512xf32, #tpu.memory_space<vmem>>, %arg3: memref<64x128xf32, #tpu.memory_space<vmem>>, %arg4: memref<40x40xf32, #tpu.memory_space<vmem>>, %arg5: memref<40x40xf32, #tpu.memory_space<vmem>>, %arg6: memref<8x40xf32, #tpu.memory_space<vmem>>, %arg7: memref<1x512xf32, #tpu.memory_space<vmem>>, %arg8: memref<128x512xf32, #tpu.memory_space<vmem>>) attributes {dimension_semantics = [#tpu.dimension_semantics<parallel>], iteration_bounds = array<i64: 2>, scalar_prefetch = 0 : i64, scratch_operands = 1 : i64, tpu.core_type = #tpu.core_type<tc>, window_params = [{transform_indices = @transform_0, window_bounds = array<i64: 6, 512>}, {transform_indices = @transform_1, window_bounds = array<i64: 8, 512>}, {pipeline_mode = #tpu.pipeline_mode<synchronous>, transform_indices = @transform_2, window_bounds = array<i64: 64, 128>}, {pipeline_mode = #tpu.pipeline_mode<synchronous>, transform_indices = @transform_3, window_bounds = array<i64: 40, 40>}, {pipeline_mode = #tpu.pipeline_mode<synchronous>, transform_indices = @transform_4, window_bounds = array<i64: 40, 40>}, {pipeline_mode = #tpu.pipeline_mode<synchronous>, transform_indices = @transform_5, window_bounds = array<i64: 8, 40>}, {transform_indices = @transform_6, window_bounds = array<i64: 1, 512>}]} {
    %c0 = arith.constant 0 : index
    %c0_0 = arith.constant 0 : index
    %0 = vector.load %arg1[%c0, %c0_0] : memref<6x512xi32, #tpu.memory_space<vmem>>, vector<6x512xi32>
    %1 = tpu.iota {dimensions = array<i32: 0>} : vector<16x512xi32>
    %2 = vector.extract_strided_slice %0 {offsets = [0, 0], sizes = [1, 512], strides = [1, 1]} : vector<6x512xi32> to vector<1x512xi32>
    %3 = vector.broadcast %2 : vector<1x512xi32> to vector<16x512xi32>
    %4 = arith.cmpi eq, %1, %3 : vector<16x512xi32>
    %5 = arith.extui %4 : vector<16x512xi1> to vector<16x512xi32>
    %6 = arith.sitofp %5 : vector<16x512xi32> to vector<16x512xf32>
    %c0_1 = arith.constant 0 : index
    %c0_2 = arith.constant 0 : index
    %7 = vector.load %arg8[%c0_1, %c0_2] : memref<128x512xf32, #tpu.memory_space<vmem>>, vector<16x512xf32>
    tpu.vector_store %arg8[%c0_1, %c0_2], %6 {strides = array<i32>} : memref<128x512xf32, #tpu.memory_space<vmem>>, vector<16x512xf32>,
    %8 = vector.extract_strided_slice %0 {offsets = [1, 0], sizes = [1, 512], strides = [1, 1]} : vector<6x512xi32> to vector<1x512xi32>
    %9 = vector.broadcast %8 : vector<1x512xi32> to vector<16x512xi32>
    %10 = arith.cmpi eq, %1, %9 : vector<16x512xi32>
    %11 = arith.extui %10 : vector<16x512xi1> to vector<16x512xi32>
    %12 = arith.sitofp %11 : vector<16x512xi32> to vector<16x512xf32>
    %c16 = arith.constant 16 : index
    %c0_3 = arith.constant 0 : index
    %13 = vector.load %arg8[%c16, %c0_3] : memref<128x512xf32, #tpu.memory_space<vmem>>, vector<16x512xf32>
    tpu.vector_store %arg8[%c16, %c0_3], %12 {strides = array<i32>} : memref<128x512xf32, #tpu.memory_space<vmem>>, vector<16x512xf32>,
    %14 = vector.extract_strided_slice %0 {offsets = [2, 0], sizes = [1, 512], strides = [1, 1]} : vector<6x512xi32> to vector<1x512xi32>
    %15 = vector.broadcast %14 : vector<1x512xi32> to vector<16x512xi32>
    %16 = arith.cmpi eq, %1, %15 : vector<16x512xi32>
    %17 = arith.extui %16 : vector<16x512xi1> to vector<16x512xi32>
    %18 = arith.sitofp %17 : vector<16x512xi32> to vector<16x512xf32>
    %c32 = arith.constant 32 : index
    %c0_4 = arith.constant 0 : index
    %19 = vector.load %arg8[%c32, %c0_4] : memref<128x512xf32, #tpu.memory_space<vmem>>, vector<16x512xf32>
    tpu.vector_store %arg8[%c32, %c0_4], %18 {strides = array<i32>} : memref<128x512xf32, #tpu.memory_space<vmem>>, vector<16x512xf32>,
    %20 = vector.extract_strided_slice %0 {offsets = [3, 0], sizes = [1, 512], strides = [1, 1]} : vector<6x512xi32> to vector<1x512xi32>
    %21 = vector.broadcast %20 : vector<1x512xi32> to vector<16x512xi32>
    %22 = arith.cmpi eq, %1, %21 : vector<16x512xi32>
    %23 = arith.extui %22 : vector<16x512xi1> to vector<16x512xi32>
    %24 = arith.sitofp %23 : vector<16x512xi32> to vector<16x512xf32>
    %c48 = arith.constant 48 : index
    %c0_5 = arith.constant 0 : index
    %25 = vector.load %arg8[%c48, %c0_5] : memref<128x512xf32, #tpu.memory_space<vmem>>, vector<16x512xf32>
    tpu.vector_store %arg8[%c48, %c0_5], %24 {strides = array<i32>} : memref<128x512xf32, #tpu.memory_space<vmem>>, vector<16x512xf32>,
    %26 = vector.extract_strided_slice %0 {offsets = [4, 0], sizes = [1, 512], strides = [1, 1]} : vector<6x512xi32> to vector<1x512xi32>
    %27 = vector.broadcast %26 : vector<1x512xi32> to vector<16x512xi32>
    %28 = arith.cmpi eq, %1, %27 : vector<16x512xi32>
    %29 = arith.extui %28 : vector<16x512xi1> to vector<16x512xi32>
    %30 = arith.sitofp %29 : vector<16x512xi32> to vector<16x512xf32>
    %c64 = arith.constant 64 : index
    %c0_6 = arith.constant 0 : index
    %31 = vector.load %arg8[%c64, %c0_6] : memref<128x512xf32, #tpu.memory_space<vmem>>, vector<16x512xf32>
    tpu.vector_store %arg8[%c64, %c0_6], %30 {strides = array<i32>} : memref<128x512xf32, #tpu.memory_space<vmem>>, vector<16x512xf32>,
    %32 = vector.extract_strided_slice %0 {offsets = [5, 0], sizes = [1, 512], strides = [1, 1]} : vector<6x512xi32> to vector<1x512xi32>
    %33 = vector.broadcast %32 : vector<1x512xi32> to vector<16x512xi32>
    %34 = arith.cmpi eq, %1, %33 : vector<16x512xi32>
    %35 = arith.extui %34 : vector<16x512xi1> to vector<16x512xi32>
    %36 = arith.sitofp %35 : vector<16x512xi32> to vector<16x512xf32>
    %c80 = arith.constant 80 : index
    %c0_7 = arith.constant 0 : index
    %37 = vector.load %arg8[%c80, %c0_7] : memref<128x512xf32, #tpu.memory_space<vmem>>, vector<16x512xf32>
    tpu.vector_store %arg8[%c80, %c0_7], %36 {strides = array<i32>} : memref<128x512xf32, #tpu.memory_space<vmem>>, vector<16x512xf32>,
    %c0_8 = arith.constant 0 : index
    %c0_9 = arith.constant 0 : index
    %38 = vector.load %arg2[%c0_8, %c0_9] : memref<8x512xf32, #tpu.memory_space<vmem>>, vector<8x512xf32>
    %c96 = arith.constant 96 : index
    %c0_10 = arith.constant 0 : index
    %39 = vector.load %arg8[%c96, %c0_10] : memref<128x512xf32, #tpu.memory_space<vmem>>, vector<8x512xf32>
    tpu.vector_store %arg8[%c96, %c0_10], %38 {strides = array<i32>} : memref<128x512xf32, #tpu.memory_space<vmem>>, vector<8x512xf32>,
    %40 = tpu.iota {dimensions = array<i32: 0>} : vector<8x512xi32>
    %c0_i32 = arith.constant 0 : i32
    %41 = vector.broadcast %c0_i32 : i32 to vector<8x512xi32>
    %42 = arith.cmpi eq, %40, %41 : vector<8x512xi32>
    %43 = arith.extui %42 : vector<8x512xi1> to vector<8x512xi32>
    %44 = arith.sitofp %43 : vector<8x512xi32> to vector<8x512xf32>
    %c104 = arith.constant 104 : index
    %c0_11 = arith.constant 0 : index
    %45 = vector.load %arg8[%c104, %c0_11] : memref<128x512xf32, #tpu.memory_space<vmem>>, vector<8x512xf32>
    tpu.vector_store %arg8[%c104, %c0_11], %44 {strides = array<i32>} : memref<128x512xf32, #tpu.memory_space<vmem>>, vector<8x512xf32>,
    %cst = arith.constant 0.000000e+00 : f32
    %46 = vector.broadcast %cst : f32 to vector<16x512xf32>
    %c112 = arith.constant 112 : index
    %c0_12 = arith.constant 0 : index
    %47 = vector.load %arg8[%c112, %c0_12] : memref<128x512xf32, #tpu.memory_space<vmem>>, vector<16x512xf32>
    tpu.vector_store %arg8[%c112, %c0_12], %46 {strides = array<i32>} : memref<128x512xf32, #tpu.memory_space<vmem>>, vector<16x512xf32>,
    %c0_13 = arith.constant 0 : index
    %c0_14 = arith.constant 0 : index
    %48 = vector.load %arg8[%c0_13, %c0_14] : memref<128x512xf32, #tpu.memory_space<vmem>>, vector<128x512xf32>
    %c0_15 = arith.constant 0 : index
    %c0_16 = arith.constant 0 : index
    %49 = vector.load %arg3[%c0_15, %c0_16] : memref<64x128xf32, #tpu.memory_space<vmem>>, vector<64x128xf32>
    %cst_17 = arith.constant dense<0.000000e+00> : vector<64x512xf32>
    %50 = tpu.matmul %49, %48, %cst_17 {dimension_numbers = #tpu.dot_dimension_numbers<[1], [0], [0], [1], [0, 0, 1, 1], [], []>} : vector<64x128xf32>, vector<128x512xf32>, vector<64x512xf32> -> vector<64x512xf32>
    %51 = vector.extract_strided_slice %50 {offsets = [0, 0], sizes = [8, 512], strides = [1, 1]} : vector<64x512xf32> to vector<8x512xf32>
    %52 = vector.extract_strided_slice %50 {offsets = [8, 0], sizes = [8, 512], strides = [1, 1]} : vector<64x512xf32> to vector<8x512xf32>
    %53 = vector.extract_strided_slice %50 {offsets = [16, 0], sizes = [1, 512], strides = [1, 1]} : vector<64x512xf32> to vector<1x512xf32>
    %54 = vector.extract_strided_slice %50 {offsets = [24, 0], sizes = [40, 512], strides = [1, 1]} : vector<64x512xf32> to vector<40x512xf32>
    %55 = arith.mulf %51, %51 : vector<8x512xf32>
    %56 = arith.subf %55, %52 : vector<8x512xf32>
    %cst_18 = arith.constant dense<0.000000e+00> : vector<512xf32>
    %57 = vector.multi_reduction <add>, %56, %cst_18 [0] : vector<8x512xf32> to vector<512xf32>
    %58 = vector.shape_cast %57 : vector<512xf32> to vector<1x512xf32>
    %cst_19 = arith.constant 5.000000e-01 : f32
    %59 = vector.broadcast %cst_19 : f32 to vector<1x512xf32>
    %60 = arith.mulf %59, %58 : vector<1x512xf32>
    %cst_20 = arith.constant 0.000000e+00 : f32
    %61 = vector.broadcast %cst_20 : f32 to vector<40x512xf32>
    %62 = arith.maximumf %54, %61 : vector<40x512xf32>
    %c0_21 = arith.constant 0 : index
    %c0_22 = arith.constant 0 : index
    %63 = vector.load %arg4[%c0_21, %c0_22] : memref<40x40xf32, #tpu.memory_space<vmem>>, vector<40x40xf32>
    %cst_23 = arith.constant dense<0.000000e+00> : vector<40x512xf32>
    %64 = tpu.matmul %63, %62, %cst_23 {dimension_numbers = #tpu.dot_dimension_numbers<[1], [0], [0], [1], [0, 0, 1, 1], [], []>} : vector<40x40xf32>, vector<40x512xf32>, vector<40x512xf32> -> vector<40x512xf32>
    %cst_24 = arith.constant 0.000000e+00 : f32
    %65 = vector.broadcast %cst_24 : f32 to vector<40x512xf32>
    %66 = arith.maximumf %64, %65 : vector<40x512xf32>
    %c0_25 = arith.constant 0 : index
    %c0_26 = arith.constant 0 : index
    %67 = vector.load %arg5[%c0_25, %c0_26] : memref<40x40xf32, #tpu.memory_space<vmem>>, vector<40x40xf32>
    %cst_27 = arith.constant dense<0.000000e+00> : vector<40x512xf32>
    %68 = tpu.matmul %67, %66, %cst_27 {dimension_numbers = #tpu.dot_dimension_numbers<[1], [0], [0], [1], [0, 0, 1, 1], [], []>} : vector<40x40xf32>, vector<40x512xf32>, vector<40x512xf32> -> vector<40x512xf32>
    %cst_28 = arith.constant 0.000000e+00 : f32
    %69 = vector.broadcast %cst_28 : f32 to vector<40x512xf32>
    %70 = arith.maximumf %68, %69 : vector<40x512xf32>
    %c0_29 = arith.constant 0 : index
    %c0_30 = arith.constant 0 : index
    %71 = vector.load %arg6[%c0_29, %c0_30] : memref<8x40xf32, #tpu.memory_space<vmem>>, vector<8x40xf32>
    %cst_31 = arith.constant dense<0.000000e+00> : vector<8x512xf32>
    %72 = tpu.matmul %71, %70, %cst_31 {dimension_numbers = #tpu.dot_dimension_numbers<[1], [0], [0], [1], [0, 0, 1, 1], [], []>} : vector<8x40xf32>, vector<40x512xf32>, vector<8x512xf32> -> vector<8x512xf32>
    %73 = vector.extract_strided_slice %72 {offsets = [0, 0], sizes = [1, 512], strides = [1, 1]} : vector<8x512xf32> to vector<1x512xf32>
    %74 = arith.addf %53, %60 : vector<1x512xf32>
    %75 = arith.addf %74, %73 : vector<1x512xf32>
    %76 = arith.negf %75 : vector<1x512xf32>
    %77 = math.exp %76 : vector<1x512xf32>
    %cst_32 = arith.constant 1.000000e+00 : f32
    %78 = vector.broadcast %cst_32 : f32 to vector<1x512xf32>
    %79 = arith.addf %78, %77 : vector<1x512xf32>
    %80 = arith.divf %78, %79 : vector<1x512xf32>
    %c0_33 = arith.constant 0 : index
    %c0_34 = arith.constant 0 : index
    %81 = vector.load %arg7[%c0_33, %c0_34] : memref<1x512xf32, #tpu.memory_space<vmem>>, vector<1x512xf32>
    tpu.vector_store %arg7[%c0_33, %c0_34], %80 {strides = array<i32>} : memref<1x512xf32, #tpu.memory_space<vmem>>, vector<1x512xf32>,
    return
  }
  func.func @transform_0(%arg0: i32) -> (i32, i32) {
    %c0_i32 = arith.constant 0 : i32
    %c0_i32_0 = arith.constant 0 : i32
    return %c0_i32, %arg0 : i32, i32
  }
  func.func @transform_1(%arg0: i32) -> (i32, i32) {
    %c0_i32 = arith.constant 0 : i32
    %c0_i32_0 = arith.constant 0 : i32
    return %c0_i32, %arg0 : i32, i32
  }
  func.func @transform_2(%arg0: i32) -> (i32, i32) {
    %c0_i32 = arith.constant 0 : i32
    %c0_i32_0 = arith.constant 0 : i32
    %c0_i32_1 = arith.constant 0 : i32
    return %c0_i32, %c0_i32_0 : i32, i32
  }
  func.func @transform_3(%arg0: i32) -> (i32, i32) {
    %c0_i32 = arith.constant 0 : i32
    %c0_i32_0 = arith.constant 0 : i32
    %c0_i32_1 = arith.constant 0 : i32
    return %c0_i32, %c0_i32_0 : i32, i32
  }
  func.func @transform_4(%arg0: i32) -> (i32, i32) {
    %c0_i32 = arith.constant 0 : i32
    %c0_i32_0 = arith.constant 0 : i32
    %c0_i32_1 = arith.constant 0 : i32
    return %c0_i32, %c0_i32_0 : i32, i32
  }
  func.func @transform_5(%arg0: i32) -> (i32, i32) {
    %c0_i32 = arith.constant 0 : i32
    %c0_i32_0 = arith.constant 0 : i32
    %c0_i32_1 = arith.constant 0 : i32
    return %c0_i32, %c0_i32_0 : i32, i32
  }
  func.func @transform_6(%arg0: i32) -> (i32, i32) {
    %c0_i32 = arith.constant 0 : i32
    %c0_i32_0 = arith.constant 0 : i32
    return %c0_i32, %arg0 : i32, i32
  }
}

</mosaic_0001>

<bundles_post_ra>
// kernel: tpu_custom_call.1
= control target key start
LH: loop header
LB: loop body
LE: loop exit
PB: predicated region body
PF: predicated region fallthrough
CT: control target
= control target key end

     0   :  { %s2586_s0 = inlined_call_operand.hbm [shape: s32[6,1024], index: 0, kind: input, shape index: {}]   ;;  %s2587_s1 = inlined_call_operand.hbm [shape: f32[8,1024], index: 1, kind: input, shape index: {}]   ;;  %s2588_s2 = inlined_call_operand.hbm [shape: f32[64,128], index: 2, kind: input, shape index: {}]   ;;  %s2589_s3 = inlined_call_operand.hbm [shape: f32[40,40], index: 3, kind: input, shape index: {}]   ;;  %s2590_s4 = inlined_call_operand.hbm [shape: f32[40,40], index: 4, kind: input, shape index: {}]   ;;  %s2591_s5 = inlined_call_operand.hbm [shape: f32[8,40], index: 5, kind: input, shape index: {}]   ;;  %s2592_s6 = inlined_call_operand.hbm [shape: f32[1,1024], index: 6, kind: output, shape index: {}]  }
   0x1   :  { %2593 = sst [smem:[#allocation22_spill]] %s2588_s2 }
   0x2   :  { %2594 = sst [smem:[#allocation23_spill]] %s2589_s3 }
   0x3   :  { %2595 = sst [smem:[#allocation24_spill]] %s2590_s4 }
   0x4   :  { %2596 = sst [smem:[#allocation25_spill]] %s2591_s5 }
   0x5   :  { %11 = vsyncpa [#allocation4], 0 }
   0x6   :  { %13 = vsyncpa [#allocation4 + $0x1], 0 }
   0x7   :  { %14 = vsyncpa [#allocation7], 0 }
   0x8   :  { %16 = vsyncpa [#allocation7 + $0x1], 0 }
   0x9   :  { %17 = vsyncpa [#allocation10], 0 }
   0xa   :  { %18 = vsyncpa [#allocation13], 0 }
   0xb   :  { %19 = vsyncpa [#allocation5], 0 }
   0xc   :  { %21 = vsyncpa [#allocation5 + $0x1], 0  ;;  %s2179_s21 = smov 0   ;;  %s2181_s22 = smov 0  }
   0xd   :  { %s2183_s23 = smov 0   ;;  %s2185_s24 = smov 0  }
   0xe LB: > { %s2597_s2 = sld [smem:[#allocation22_spill]]  ;;  %s2203_s28 = sadd.s32 4294967295, %s2135_s24   ;;  %s2135_s24 = sphi %s2185_s24, %s2616_s24   ;;  %s2131_s23 = sphi %s2183_s23, %s2615_s23   ;;  %s2127_s22 = sphi %s2181_s22, %s2614_s22   ;;  %s2123_s21 = sphi %s2179_s21, %s2613_s21  }
   0xf   : > { %p1587_p0 = scmp.ge.s32.totalorder %s2135_s24, 1  ;;  %p48_p1 = scmp.eq.s32.totalorder %s2203_s28, 0 }
  0x10   : > { %p194_p2 = scmp.lt.s32.totalorder %s2135_s24, 3  ;;  %s2137_s30 = smov [#allocation8]  }
  0x11   : > { %s207_s7 = sshll.u32 %s2137_s30, 4  ;;  %s2599_s3 = sld [smem:[#allocation23_spill]]  ;;  %s208_s7 = int_to_ptr.vmem [resolvable:$true] %s207_s7 }
  0x12   : > { %p2208_p3 = pnand %p1587_p0, %p194_p2  ;;  %s2601_s4 = sld [smem:[#allocation24_spill]] }
  0x13   : > { %s2138_s15 = smov [#allocation9]   ;;  %s2139_s17 = smov 128  }
  0x14   : > { %s205_s27 = sshll.u32 %s2597_s2, 4  ;;  %p1784_p4 = pneg %p2208_p3  ;;  %s206_s27 = int_to_ptr.hbm [resolvable:$true] %s205_s27 }
  0x15   : > { %s221_s16 = sshll.u32 %s2138_s15, 4  ;;  %s2140_s18 = smov 8   ;;  %s222_s16 = int_to_ptr.vmem [resolvable:$true] %s221_s16 }
  0x16   : > { %p2220_p6 = pnand %p1784_p4, %p48_p1  ;;  %s2602_s5 = sld [smem:[#allocation25_spill]] }
  0x17   : > { %s219_s10 = sshll.u32 %s2599_s3, 4  ;;  %s2141_s26 = smov [#allocation11]   ;;  %s220_s10 = int_to_ptr.hbm [resolvable:$true] %s219_s10 }
  0x18   : > { %s233_s14 = sshll.u32 %s2601_s4, 4  ;;  %s235_s30 = sshll.u32 %s2141_s26, 4  ;;  %s234_s14 = int_to_ptr.hbm [resolvable:$true] %s233_s14  ;;  %s236_s30 = int_to_ptr.vmem [resolvable:$true] %s235_s30 }
  0x19   : > { %1787 = dma.hbm_to_vmem [thread:$0]  (!%p2220_p6), %s206_s27, 1024, %s208_s7, [#allocation7], %s2139_s17, %s2139_s17, %s2140_s18  }
  0x1a   : > { %1790 = dma.hbm_to_vmem [thread:$0]  (!%p2220_p6), %s220_s10, 640, %s222_s16, [#allocation10], %s2139_s17, %s2139_s17, %s2140_s18  }
  0x1b   : > { %1793 = dma.hbm_to_vmem [thread:$0]  (!%p2220_p6), %s234_s14, 640, %s236_s30, [#allocation10], %s2139_s17, %s2139_s17, %s2140_s18  }
  0x1c   : > { %s248_s25 = sshll.u32 %s2602_s5, 4  ;;  %s2142_s27 = smov [#allocation12]   ;;  %s249_s25 = int_to_ptr.hbm [resolvable:$true] %s248_s25 }
  0x1d   : > { %s250_s7 = sshll.u32 %s2142_s27, 4  ;;  %s1586_s8 = sadd.s32 4294967294, %s2135_s24   ;;  %s251_s7 = int_to_ptr.vmem [resolvable:$true] %s250_s7 }
  0x1e   : > { %1796 = dma.hbm_to_vmem [thread:$0]  (!%p2220_p6), %s249_s25, 128, %s251_s7, [#allocation13]  }
  0x1f   : > { %s2240_s9 = sadd.s32 1, %s2135_s24   ;;  %s34_s12 = sadd.s32 1, %s2131_s23 }
  0x20   : > { %s31_s10 = ssub.s32 %s2135_s24, %s2240_s9  ;;  %p41_p8 = scmp.ne.s32.totalorder %s2131_s23, %s2127_s22 }
  0x21   : > { %p32_p7 = scmp.eq.s32.totalorder %s31_s10, 0  ;;  %p42_p9 = scmp.eq.s32.totalorder %s2135_s24, 0 }
  0x22   : > { %p47_p10 = scmp.ne.s32.totalorder %s2127_s22, %s2123_s21  ;;  %p181_p13 = scmp.eq.s32.totalorder %s2203_s28, 1 }
  0x23   : > { %s2251_s13 = scalar_select %p32_p7, %s2131_s23, %s34_s12  }
  0x24   : > { %p2253_p11 = por %p42_p9, %p41_p8  ;;  %p2259_p12 = por %p48_p1, %p47_p10 }
  0x25   : > { %2603 = sst [smem:[#allocation21_spill]] %s2251_s13  ;;  %p187_p0 = scmp.eq.s32.totalorder %s1586_s8, 1 }
  0x26   : > { %p1812_p2 = scmp.lt.s32.totalorder %s2135_s24, 2  ;;  %s261_s15 = sand.u32 1, %s2131_s23  }
  0x27   : > { %p2266_p4 = por %p181_p13, %p41_p8  ;;  %p2270_p6 = por %p187_p0, %p47_p10 }
  0x28   : > { %s2274_s18 = sshll.u32 %s261_s15, 5  ;;  %s1708_s19 = sshll.u32 %s2135_s24, 5 }
  0x29   : > { %s270_s26 = scalar_lea.hbm %s2586_s0, %s1708_s19  ;;  %s265_s30 = scalar_lea.vmem [#allocation3], %s2274_s18 }
  0x2a   : > { %s274_s27 = sshll.u32 %s265_s30, 4  ;;  %s272_s7 = sshll.u32 %s270_s26, 4  ;;  %s275_s27 = int_to_ptr.vmem [resolvable:$true] %s274_s27  ;;  %s273_s7 = int_to_ptr.hbm [resolvable:$true] %s272_s7 }
  0x2b   : > { %p2283_p7 = pnand %p1812_p2, %p2253_p11  ;;  %s290_s2 = scalar_lea.hbm %s2587_s1, %s1708_s19 }
  0x2c   : > { %s281_s3 = sand.u32 1, %s2135_s24   ;;  %s262_s4 = scalar_lea.sflag [#allocation4], %s261_s15 }
  0x2d   : > { %s1993_s20 = sshra.s32 %s273_s7, 4  ;;  %p1997_p9 = pneg %p2283_p7  ;;  %s1994_s20 = int_to_ptr.hbm [resolvable:$true] %s1993_s20 }
  0x2e   : > { %s1995_s25 = scalar_lea.hbm %s1994_s20, 32  ;;  %s2000_s30 = scalar_lea.hbm %s2586_s0, 64 }
  0x2f   : > { %p1996_p8 = scmp.ne.s32.totalorder %s1994_s20, %s1995_s25  ;;  %p2001_p13 = scmp.lt.s32.totalorder %s1994_s20, %s2586_s0 }
  0x30   : > { %p2002_p0 = scmp.lt.s32.totalorder %s2000_s30, %s1995_s25 }
  0x31   : > { %p1998_p10 = pnand %p1997_p9, %p1996_p8 }
  0x32   : > { %p2003_p2 = por %p2002_p0, %p2001_p13 }
  0x33   : > { %p1999_p11 = pneg %p1998_p10 }
  0x35   : > { %p2004_p5 = pnand %p2003_p2, %p1999_p11 }
  0x37   : > { %2007 = shalt.err (!%p2004_p5)
}
  0x38   : > { %1800 = dma.hbm_to_vmem [thread:$0]  (!%p2283_p7), %s273_s7, 512, %s275_s27, %s262_s4  }
  0x39   : > { %s292_s15 = sshll.u32 %s290_s2, 4  ;;  %s285_s19 = scalar_lea.vmem [#allocation6], %s2274_s18  ;;  %s293_s15 = int_to_ptr.hbm [resolvable:$true] %s292_s15 }
  0x3a   : > { %s294_s5 = sshll.u32 %s285_s19, 4  ;;  %s282_s14 = scalar_lea.sflag [#allocation7], %s281_s3  ;;  %s295_s5 = int_to_ptr.vmem [resolvable:$true] %s294_s5 }
  0x3b   : > { %s2023_s26 = sshra.s32 %s293_s15, 4  ;;  %s2030_s30 = scalar_lea.hbm %s2587_s1, 64  ;;  %s2024_s26 = int_to_ptr.hbm [resolvable:$true] %s2023_s26 }
  0x3c   : > { %s2025_s13 = scalar_lea.hbm %s2024_s26, 32  ;;  %p2031_p5 = scmp.lt.s32.totalorder %s2024_s26, %s2587_s1 }
  0x3d   : > { %p2026_p8 = scmp.ne.s32.totalorder %s2024_s26, %s2025_s13  ;;  %p2032_p13 = scmp.lt.s32.totalorder %s2030_s30, %s2025_s13 }
  0x3f   : > { %p2028_p10 = pnand %p2026_p8, %p1997_p9  ;;  %p2033_p0 = por %p2032_p13, %p2031_p5 }
  0x41   : > { %p2029_p11 = pneg %p2028_p10 }
  0x43   : > { %p2034_p2 = pnand %p2033_p0, %p2029_p11 }
  0x45   : > { %2037 = shalt.err (!%p2034_p2)
}
  0x46   : > { %1803 = dma.hbm_to_vmem [thread:$0]  (!%p2283_p7), %s293_s15, 512, %s295_s5, %s282_s14  }
  0x47   : > { %303 = sbr.rel (%p2208_p3) target bundleno = 839 (0x347), region = 44  ;;  %s2319_s2 = sand.u32 (!%p2208_p3), 1, %s2127_s22  }
  0x48   : > { %s1600_s3 = sshll.u32 (!%p2208_p3), %s2319_s2, 5  ;;  %s306_s18 = scalar_lea.sflag (!%p2208_p3), [#allocation4], %s2319_s2 }
  0x49   : > { %s2323_s27 = scalar_lea.vmem (!%p2208_p3), [#allocation3], %s1600_s3 }
  0x4c   : > { %2098 = dma.done.wait (%p2259_p12), %s306_s18, 512  }
  0x4d   : > { %2100 = vsyncadd (%p2259_p12), %s306_s18, 4294966784  ;;  %s315_s5 = sand.u32 1, %s2203_s28   ;;  %s319_s13 = scalar_lea.vmem [#allocation6], %s1600_s3 }
  0x4e   : > { %s316_s29 = scalar_lea.sflag [#allocation7], %s315_s5 }
  0x4f   : > { %2102 = dma.done.wait (%p2259_p12), %s316_s29, 512  }
  0x50   : > { %2104 = vsyncadd (%p2259_p12), %s316_s29, 4294966784 }
  0x51   : > { %2106 = dma.done.wait (%p48_p1), [#allocation7], 1024  }
  0x52   : > { %2108 = vsyncadd (%p48_p1), [#allocation7], 4294966272 }
  0x53   : > { %2110 = dma.done.wait (%p48_p1), [#allocation10], 1280  }
  0x54   : > { %2112 = vsyncadd (%p48_p1), [#allocation10], 4294966016 }
  0x55   : > { %2114 = dma.done.wait (%p48_p1), [#allocation13], 128  }
  0x56   : > { %2116 = vsyncadd (%p48_p1), [#allocation13], 4294967168  ;;  %v381_v0 = vlaneseq  ;;  %v2143_v2 = vmov 1.0   ;;  %v600_v3 = vld [vmem:[%s319_s13] sm:$0xff]  ;;  %v601_v4 = vld [vmem:[%s319_s13 + $0x8] sm:$0xff]  ;;  %s1606_s11 = sshll.u32 %s2319_s2, 2 }
  0x57   : > { %v602_v5 = vld [vmem:[%s319_s13 + $0x10] sm:$0xff]  ;;  %v603_v7 = vld [vmem:[%s319_s13 + $0x18] sm:$0xff]  ;;  %v2358_v8 = vld [vmem:[%s2323_s27] sm:$0x3f]  ;;  %s1705_s7 = sshll.u32 %s2203_s28, 2  ;;  %s373_s28 = scalar_lea.vmem [#allocation14], %s1606_s11 }
  0x58   : > { %v2347_v1 = vshrl.u32 %v381_v0, 7  ;;  %v2361_v9 = vld [vmem:[%s2323_s27 + $0x8] sm:$0x3f]  ;;  %v564_v10 = vperm.slane %v2358_v8, 5  ;;  %v2366_v12 = vld [vmem:[%s2323_s27 + $0x10] sm:$0x3f]  ;;  %s1450_s15 = scalar_lea.hbm %s2592_s6, %s1705_s7 }
  0x59   : > { %v565_v11 = vperm.slane %v2361_v9, 5  ;;  %v2369_v13 = vld [vmem:[%s2323_s27 + $0x18] sm:$0x3f]  ;;  %v566_v14 = vperm.slane %v2366_v12, 5  ;;  %v528_v16 = vperm.slane %v2358_v8, 4  ;;  %v529_v17 = vperm.slane %v2361_v9, 4 }
  0x5a   : > { %vm608_vm0 = vcmp.eq.s32.totalorder %v2347_v1, 0  ;;  %v2355_v6 = vadd.s32 8, %v2347_v1  ;;  %v567_v15 = vperm.slane %v2369_v13, 5  ;;  %vm568_vm3 = vcmp.eq.s32.totalorder %v2347_v1, %v564_v10  ;;  %v687_v36 = vld [vmem:[#allocation8] sm:$0xff]  ;;  %v688_v37 = vld [vmem:[#allocation8 + $0x8] sm:$0xff]  ;;  %v689_v38 = vld [vmem:[#allocation8 + $0x10] sm:$0xff] }
  0x5b   : > { %1710 = vmatpush.msk.msra.mxu0 %vm608_vm0, %v2143_v2  ;;  %1723 = vmatpush.msk.msra.mxu1 %vm608_vm0, %v2143_v2  ;;  %vm569_vm4 = vcmp.eq.s32.totalorder %v2347_v1, %v565_v11  ;;  %vm570_vm7 = vcmp.eq.s32.totalorder %v2347_v1, %v566_v14  ;;  %v530_v18 = vperm.slane %v2366_v12, 4  ;;  %v531_v19 = vperm.slane %v2369_v13, 4  ;;  %v690_v39 = vld [vmem:[#allocation8 + $0x18] sm:$0xff]  ;;  %v691_v40 = vld [vmem:[#allocation8 + $0x20] sm:$0xff]  ;;  %v692_v41 = vld [vmem:[#allocation8 + $0x28] sm:$0xff]  ;;  %s1452_s19 = sshll.u32 %s373_s28, 4  ;;  %s1453_s19 = int_to_ptr.vmem [resolvable:$true] %s1452_s19 }
  0x5c   : > { %1736 = vmatpush.msk.msra.mxu2 %vm608_vm0, %v2143_v2  ;;  %1749 = vmatpush.msk.msra.mxu3 %vm608_vm0, %v2143_v2  ;;  %vm572_vm1 = vcmp.eq.s32.totalorder %v2355_v6, %v564_v10  ;;  %vm573_vm2 = vcmp.eq.s32.totalorder %v2355_v6, %v565_v11  ;;  %vm574_vm5 = vcmp.eq.s32.totalorder %v2355_v6, %v566_v14  ;;  %v492_v20 = vperm.slane %v2358_v8, 3  ;;  %v693_v42 = vld [vmem:[#allocation8 + $0x30] sm:$0xff]  ;;  %v694_v43 = vld [vmem:[#allocation8 + $0x38] sm:$0xff]  ;;  %s1454_s14 = sshll.u32 %s1450_s15, 4  ;;  %s1440_s26 = scalar_lea.sflag [#allocation5], %s2319_s2  ;;  %s1455_s14 = int_to_ptr.hbm [resolvable:$true] %s1454_s14 }
  0x5d   : > { %698 = vmatpush.msra.mxu0 %v600_v3  ;;  %739 = vmatpush.msra.mxu1 %v601_v4  ;;  %vm575_vm6 = vcmp.eq.s32.totalorder %v2355_v6, %v567_v15  ;;  %vm571_vm8 = vcmp.eq.s32.totalorder %v2347_v1, %v567_v15  ;;  %vm536_vm9 = vcmp.eq.s32.totalorder %v2355_v6, %v528_v16  ;;  %v493_v21 = vperm.slane %v2361_v9, 3  ;;  %s2067_s20 = sshra.s32 %s1455_s14, 4  ;;  %s2073_s4 = scalar_lea.hbm %s2592_s6, 8  ;;  %s2068_s20 = int_to_ptr.hbm [resolvable:$true] %s2067_s20 }
  0x5e   : > { %780 = vmatpush.msra.mxu2 %v602_v5  ;;  %821 = vmatpush.msra.mxu3 %v603_v7  ;;  %vm537_vm10 = vcmp.eq.s32.totalorder %v2355_v6, %v529_v17  ;;  %vm538_vm11 = vcmp.eq.s32.totalorder %v2355_v6, %v530_v18  ;;  %vm539_vm12 = vcmp.eq.s32.totalorder %v2355_v6, %v531_v19  ;;  %v494_v22 = vperm.slane %v2366_v12, 3  ;;  %s2069_s25 = scalar_lea.hbm %s2068_s20, 4  ;;  %p2074_p7 = scmp.lt.s32.totalorder %s2068_s20, %s2592_s6 }
  0x5f   : > { %1711 = vmatpush.msk.msra.mxu0 %vm572_vm1, %v2143_v2  ;;  %1724 = vmatpush.msk.msra.mxu1 %vm573_vm2, %v2143_v2  ;;  %vm532_vm13 = vcmp.eq.s32.totalorder %v2347_v1, %v528_v16  ;;  %vm533_vm14 = vcmp.eq.s32.totalorder %v2347_v1, %v529_v17  ;;  %vm534_vm15 = vcmp.eq.s32.totalorder %v2347_v1, %v530_v18  ;;  %v495_v23 = vperm.slane %v2369_v13, 3  ;;  %p2070_p1 = scmp.ne.s32.totalorder %s2068_s20, %s2069_s25  ;;  %p2075_p9 = scmp.lt.s32.totalorder %s2073_s4, %s2069_s25 }
  0x60   : > { %1737 = vmatpush.msk.msra.mxu2 %vm574_vm5, %v2143_v2  ;;  %1750 = vmatpush.msk.msra.mxu3 %vm575_vm6, %v2143_v2  ;;  %vm535_vm0 = vcmp.eq.s32.totalorder %v2347_v1, %v531_v19  ;;  %vm500_vm1 = vcmp.eq.s32.totalorder %v2355_v6, %v492_v20  ;;  %vm501_vm2 = vcmp.eq.s32.totalorder %v2355_v6, %v493_v21  ;;  %v456_v24 = vperm.slane %v2358_v8, 2 }
  0x61   : > { %1712 = vmatpush.msk.msra.mxu0 %vm568_vm3, %v2143_v2  ;;  %1725 = vmatpush.msk.msra.mxu1 %vm569_vm4, %v2143_v2  ;;  %v457_v25 = vperm.slane %v2361_v9, 2  ;;  %vm502_vm3 = vcmp.eq.s32.totalorder %v2355_v6, %v494_v22  ;;  %vm503_vm4 = vcmp.eq.s32.totalorder %v2355_v6, %v495_v23  ;;  %v458_v26 = vperm.slane %v2366_v12, 2  ;;  %p2071_p3 = pnand %p2070_p1, %p2266_p4  ;;  %p2076_p8 = por %p2075_p9, %p2074_p7 }
  0x62   : > { %1738 = vmatpush.msk.msra.mxu2 %vm570_vm7, %v2143_v2  ;;  %1751 = vmatpush.msk.msra.mxu3 %vm571_vm8, %v2143_v2  ;;  %vm496_vm5 = vcmp.eq.s32.totalorder %v2347_v1, %v492_v20  ;;  %vm497_vm6 = vcmp.eq.s32.totalorder %v2347_v1, %v493_v21  ;;  %v459_v27 = vperm.slane %v2369_v13, 2  ;;  %vm498_vm7 = vcmp.eq.s32.totalorder %v2347_v1, %v494_v22 }
  0x63   : > { %1713 = vmatpush.msk.msra.mxu0 %vm536_vm9, %v2143_v2  ;;  %1726 = vmatpush.msk.msra.mxu1 %vm537_vm10, %v2143_v2  ;;  %vm499_vm8 = vcmp.eq.s32.totalorder %v2347_v1, %v495_v23  ;;  %vm464_vm9 = vcmp.eq.s32.totalorder %v2355_v6, %v456_v24  ;;  %vm465_vm10 = vcmp.eq.s32.totalorder %v2355_v6, %v457_v25  ;;  %v420_v28 = vperm.slane %v2358_v8, 1  ;;  %p2072_p12 = pneg %p2071_p3 }
  0x64   : > { %1739 = vmatpush.msk.msra.mxu2 %vm538_vm11, %v2143_v2  ;;  %1752 = vmatpush.msk.msra.mxu3 %vm539_vm12, %v2143_v2  ;;  %v421_v29 = vperm.slane %v2361_v9, 1  ;;  %vm466_vm11 = vcmp.eq.s32.totalorder %v2355_v6, %v458_v26  ;;  %vm467_vm12 = vcmp.eq.s32.totalorder %v2355_v6, %v459_v27  ;;  %v422_v30 = vperm.slane %v2366_v12, 1 }
  0x65   : > { %1714 = vmatpush.msk.msra.mxu0 %vm532_vm13, %v2143_v2  ;;  %1727 = vmatpush.msk.msra.mxu1 %vm533_vm14, %v2143_v2  ;;  %v423_v31 = vperm.slane %v2369_v13, 1  ;;  %vm460_vm13 = vcmp.eq.s32.totalorder %v2347_v1, %v456_v24  ;;  %vm461_vm14 = vcmp.eq.s32.totalorder %v2347_v1, %v457_v25  ;;  %v384_v32 = vperm.slane %v2358_v8, 0  ;;  %p2077_p10 = pnand %p2076_p8, %p2072_p12 }
  0x66   : > { %1740 = vmatpush.msk.msra.mxu2 %vm534_vm15, %v2143_v2  ;;  %1753 = vmatpush.msk.msra.mxu3 %vm535_vm0, %v2143_v2  ;;  %vm462_vm15 = vcmp.eq.s32.totalorder %v2347_v1, %v458_v26  ;;  %vm463_vm0 = vcmp.eq.s32.totalorder %v2347_v1, %v459_v27  ;;  %v385_v33 = vperm.slane %v2361_v9, 0  ;;  %v386_v34 = vperm.slane %v2366_v12, 0 }
  0x67   : > { %1715 = vmatpush.msk.msra.mxu0 %vm500_vm1, %v2143_v2  ;;  %1728 = vmatpush.msk.msra.mxu1 %vm501_vm2, %v2143_v2  ;;  %vm428_vm1 = vcmp.eq.s32.totalorder %v2355_v6, %v420_v28  ;;  %vm429_vm2 = vcmp.eq.s32.totalorder %v2355_v6, %v421_v29  ;;  %v387_v35 = vperm.slane %v2369_v13, 0 }
  0x68   : > { %1741 = vmatpush.msk.msra.mxu2 %vm502_vm3, %v2143_v2  ;;  %1754 = vmatpush.msk.msra.mxu3 %vm503_vm4, %v2143_v2  ;;  %vm430_vm3 = vcmp.eq.s32.totalorder %v2355_v6, %v422_v30  ;;  %vm431_vm4 = vcmp.eq.s32.totalorder %v2355_v6, %v423_v31 }
  0x69   : > { %1716 = vmatpush.msk.msra.mxu0 %vm496_vm5, %v2143_v2  ;;  %1729 = vmatpush.msk.msra.mxu1 %vm497_vm6, %v2143_v2  ;;  %vm424_vm5 = vcmp.eq.s32.totalorder %v2347_v1, %v420_v28  ;;  %vm425_vm6 = vcmp.eq.s32.totalorder %v2347_v1, %v421_v29 }
  0x6a   : > { %1742 = vmatpush.msk.msra.mxu2 %vm498_vm7, %v2143_v2  ;;  %1755 = vmatpush.msk.msra.mxu3 %vm499_vm8, %v2143_v2  ;;  %vm426_vm7 = vcmp.eq.s32.totalorder %v2347_v1, %v422_v30  ;;  %vm427_vm8 = vcmp.eq.s32.totalorder %v2347_v1, %v423_v31 }
  0x6b   : > { %1717 = vmatpush.msk.msra.mxu0 %vm464_vm9, %v2143_v2  ;;  %1730 = vmatpush.msk.msra.mxu1 %vm465_vm10, %v2143_v2  ;;  %vm392_vm9 = vcmp.eq.s32.totalorder %v2355_v6, %v384_v32  ;;  %vm393_vm10 = vcmp.eq.s32.totalorder %v2355_v6, %v385_v33 }
  0x6c   : > { %1743 = vmatpush.msk.msra.mxu2 %vm466_vm11, %v2143_v2  ;;  %1756 = vmatpush.msk.msra.mxu3 %vm467_vm12, %v2143_v2  ;;  %vm394_vm11 = vcmp.eq.s32.totalorder %v2355_v6, %v386_v34  ;;  %vm395_vm12 = vcmp.eq.s32.totalorder %v2355_v6, %v387_v35 }
  0x6d   : > { %1718 = vmatpush.msk.msra.mxu0 %vm460_vm13, %v2143_v2  ;;  %1731 = vmatpush.msk.msra.mxu1 %vm461_vm14, %v2143_v2  ;;  %vm388_vm13 = vcmp.eq.s32.totalorder %v2347_v1, %v384_v32  ;;  %vm389_vm14 = vcmp.eq.s32.totalorder %v2347_v1, %v385_v33 }
  0x6e   : > { %1744 = vmatpush.msk.msra.mxu2 %vm462_vm15, %v2143_v2  ;;  %1757 = vmatpush.msk.msra.mxu3 %vm463_vm0, %v2143_v2  ;;  %vm390_vm15 = vcmp.eq.s32.totalorder %v2347_v1, %v386_v34  ;;  %vm391_vm0 = vcmp.eq.s32.totalorder %v2347_v1, %v387_v35 }
  0x6f   : > { %1719 = vmatpush.msk.msra.mxu0 %vm428_vm1, %v2143_v2  ;;  %1732 = vmatpush.msk.msra.mxu1 %vm429_vm2, %v2143_v2  ;;  %vm920_vm1 = vcmask 326656  }
  0x70   : > { %1745 = vmatpush.msk.msra.mxu2 %vm430_vm3, %v2143_v2  ;;  %1758 = vmatpush.msk.msra.mxu3 %vm431_vm4, %v2143_v2 }
  0x71   : > { %1720 = vmatpush.msk.msra.mxu0 %vm424_vm5, %v2143_v2  ;;  %1733 = vmatpush.msk.msra.mxu1 %vm425_vm6, %v2143_v2 }
  0x72   : > { %1746 = vmatpush.msk.msra.mxu2 %vm426_vm7, %v2143_v2  ;;  %1759 = vmatpush.msk.msra.mxu3 %vm427_vm8, %v2143_v2 }
  0x73   : > { %1721 = vmatpush.msk.msra.mxu0 %vm392_vm9, %v2143_v2  ;;  %1734 = vmatpush.msk.msra.mxu1 %vm393_vm10, %v2143_v2  ;;  %vm1427_vm9 = vcmask 1040384  }
  0x74   : > { %1747 = vmatpush.msk.msra.mxu2 %vm394_vm11, %v2143_v2  ;;  %1760 = vmatpush.msk.msra.mxu3 %vm395_vm12, %v2143_v2 }
  0x75   : > { %1722 = vmatpush.msk.msra.mxu0 %vm388_vm13, %v2143_v2  ;;  %1735 = vmatpush.msk.msra.mxu1 %vm389_vm14, %v2143_v2 }
  0x76   : > { %1748 = vmatpush.msk.msra.mxu2 %vm390_vm15, %v2143_v2  ;;  %1761 = vmatpush.msk.msra.mxu3 %vm391_vm0, %v2143_v2 }
  0x77   : > { %711 = vmatmul.f32.vlgmr.msra.gmra.mxu0 %v687_v36  ;;  %752 = vmatmul.f32.vlgmr.msra.gmra.mxu1 %v687_v36 }
  0x78   : > { %793 = vmatmul.f32.vlgmr.msra.gmra.mxu2 %v687_v36  ;;  %834 = vmatmul.f32.vlgmr.msra.gmra.mxu3 %v687_v36 }
  0x7f   : > { %714 = vmatmul.f32.gmra.mxu0 %v688_v37  ;;  %755 = vmatmul.f32.gmra.mxu1 %v688_v37 }
  0x80   : > { %796 = vmatmul.f32.gmra.mxu2 %v688_v37  ;;  %837 = vmatmul.f32.gmra.mxu3 %v688_v37 }
  0x87   : > { %717 = vmatmul.f32.gmra.mxu0 %v689_v38  ;;  %758 = vmatmul.f32.gmra.mxu1 %v689_v38 }
  0x88   : > { %799 = vmatmul.f32.gmra.mxu2 %v689_v38  ;;  %840 = vmatmul.f32.gmra.mxu3 %v689_v38 }
  0x8f   : > { %720 = vmatmul.f32.gmra.mxu0 %v690_v39  ;;  %761 = vmatmul.f32.gmra.mxu1 %v690_v39 }
  0x90   : > { %802 = vmatmul.f32.gmra.mxu2 %v690_v39  ;;  %843 = vmatmul.f32.gmra.mxu3 %v690_v39 }
  0x97   : > { %723 = vmatmul.f32.gmra.mxu0 %v691_v40  ;;  %764 = vmatmul.f32.gmra.mxu1 %v691_v40 }
  0x98   : > { %805 = vmatmul.f32.gmra.mxu2 %v691_v40  ;;  %846 = vmatmul.f32.gmra.mxu3 %v691_v40 }
  0x9f   : > { %726 = vmatmul.f32.gmra.mxu0 %v692_v41  ;;  %767 = vmatmul.f32.gmra.mxu1 %v692_v41 }
  0xa0   : > { %808 = vmatmul.f32.gmra.mxu2 %v692_v41  ;;  %849 = vmatmul.f32.gmra.mxu3 %v692_v41 }
  0xa7   : > { %729 = vmatmul.f32.gmra.mxu0 %v693_v42  ;;  %770 = vmatmul.f32.gmra.mxu1 %v693_v42 }
  0xa8   : > { %811 = vmatmul.f32.gmra.mxu2 %v693_v42  ;;  %852 = vmatmul.f32.gmra.mxu3 %v693_v42 }
  0xaf   : > { %732 = vmatmul.f32.gmra.mxu0 %v694_v43  ;;  %773 = vmatmul.f32.gmra.mxu1 %v694_v43 }
  0xb0   : > { %814 = vmatmul.f32.gmra.mxu2 %v694_v43  ;;  %855 = vmatmul.f32.gmra.mxu3 %v694_v43 }
  0xf4   : > { %v712_v44 = vpop.f32.mrf.mxu0  ;;  %v753_v45 = vpop.f32.mrf.mxu1 }
  0xf5   : > { %v859_v46 = vmul.f32 %v712_v44, %v712_v44  ;;  %v860_v47 = vmul.f32 %v753_v45, %v753_v45 }
  0xfb   : > { %v794_v48 = vpop.f32.mrf.mxu2  ;;  %v835_v49 = vpop.f32.mrf.mxu3 }
  0xfc   : > { %v715_v50 = vpop.f32.mrf.mxu0  ;;  %v756_v51 = vpop.f32.mrf.mxu1  ;;  %v861_v58 = vmul.f32 %v794_v48, %v794_v48  ;;  %v862_v59 = vmul.f32 %v835_v49, %v835_v49 }
  0xfd   : > { %v863_v52 = vsub.f32 %v859_v46, %v715_v50  ;;  %v864_v53 = vsub.f32 %v860_v47, %v756_v51 }
  0xff   : > { %v867_v54 = vrot.slane %v863_v52, 4  ;;  %v873_v55 = vrot.slane %v864_v53, 4 }
 0x101   : > { %v868_v56 = vadd.f32 %v867_v54, %v863_v52  ;;  %v874_v57 = vadd.f32 %v873_v55, %v864_v53 }
 0x103   : > { %v869_v60 = vrot.slane %v868_v56, 2  ;;  %v875_v61 = vrot.slane %v874_v57, 2  ;;  %v797_v62 = vpop.f32.mrf.mxu2  ;;  %v838_v63 = vpop.f32.mrf.mxu3 }
 0x104   : > { %v865_v1 = vsub.f32 %v861_v58, %v797_v62  ;;  %v866_v2 = vsub.f32 %v862_v59, %v838_v63  ;;  %v718_v3 = vpop.f32.mrf.mxu0  ;;  %v759_v4 = vpop.f32.mrf.mxu1 }
 0x105   : > { %v870_v5 = vadd.f32 %v869_v60, %v868_v56  ;;  %v876_v6 = vadd.f32 %v875_v61, %v874_v57 }
 0x106   : > { %v879_v7 = vrot.slane %v865_v1, 4  ;;  %v885_v8 = vrot.slane %v866_v2, 4 }
 0x107   : > { %v871_v9 = vrot.slane %v870_v5, 1  ;;  %v877_v10 = vrot.slane %v876_v6, 1 }
 0x108   : > { %v880_v11 = vadd.f32 %v879_v7, %v865_v1  ;;  %v886_v12 = vadd.f32 %v885_v8, %v866_v2 }
 0x109   : > { %v872_v13 = vadd.f32 %v871_v9, %v870_v5  ;;  %v878_v14 = vadd.f32 %v877_v10, %v876_v6 }
 0x10a   : > { %v881_v15 = vrot.slane %v880_v11, 2  ;;  %v887_v16 = vrot.slane %v886_v12, 2 }
 0x10b   : > { %v891_v17 = vmul.f32 0.5, %v872_v13  ;;  %v892_v18 = vmul.f32 0.5, %v878_v14  ;;  %v800_v19 = vpop.f32.mrf.mxu2  ;;  %v841_v20 = vpop.f32.mrf.mxu3  ;;  %v918_v13 = vld [vmem:[#allocation9 + $0x18] sm:$0xff]  ;;  %v919_v14 = vld [vmem:[#allocation9 + $0x20] sm:$0xff] }
 0x10c   : > { %v882_v21 = vadd.f32 %v881_v15, %v880_v11  ;;  %v888_v22 = vadd.f32 %v887_v16, %v886_v12  ;;  %v721_v23 = vpop.f32.mrf.mxu0  ;;  %v762_v24 = vpop.f32.mrf.mxu1  ;;  %v916_v11 = vld [vmem:[#allocation9 + $0x8] sm:$0xff]  ;;  %v917_v12 = vld [vmem:[#allocation9 + $0x10] sm:$0xff] }
 0x10d   : > { %v2489_v25 = vadd.f32 %v891_v17, %v718_v3  ;;  %v2491_v26 = vadd.f32 %v892_v18, %v759_v4  ;;  %v895_v63 = vmax.f32 %v721_v23, 0.0  ;;  %v896_v1 = vmax.f32 %v762_v24, 0.0  ;;  %v915_v4 = vld [vmem:[#allocation9] sm:$0xff] }
 0x10e   : > { %v883_v27 = vrot.slane %v882_v21, 1  ;;  %v889_v28 = vrot.slane %v888_v22, 1 }
 0x110   : > { %v884_v29 = vadd.f32 %v883_v27, %v882_v21  ;;  %v890_v30 = vadd.f32 %v889_v28, %v888_v22 }
 0x112   : > { %v893_v31 = vmul.f32 0.5, %v884_v29  ;;  %v894_v32 = vmul.f32 0.5, %v890_v30 }
 0x113   : > { %v803_v33 = vpop.f32.mrf.mxu2  ;;  %v844_v34 = vpop.f32.mrf.mxu3 }
 0x114   : > { %v2493_v35 = vadd.f32 %v893_v31, %v800_v19  ;;  %v2495_v36 = vadd.f32 %v894_v32, %v841_v20  ;;  %v724_v37 = vpop.f32.mrf.mxu0  ;;  %v765_v38 = vpop.f32.mrf.mxu1  ;;  %v897_v9 = vmax.f32 %v803_v33, 0.0  ;;  %v898_v10 = vmax.f32 %v844_v34, 0.0 }
 0x115   : > { %v899_v57 = vmax.f32 %v724_v37, 0.0  ;;  %v900_v58 = vmax.f32 %v765_v38, 0.0 }
 0x11b   : > { %v806_v39 = vpop.f32.mrf.mxu2  ;;  %v847_v40 = vpop.f32.mrf.mxu3 }
 0x11c   : > { %v727_v41 = vpop.f32.mrf.mxu0  ;;  %v768_v42 = vpop.f32.mrf.mxu1  ;;  %v901_v7 = vmax.f32 %v806_v39, 0.0  ;;  %v902_v8 = vmax.f32 %v847_v40, 0.0 }
 0x11d   : > { %v903_v55 = vmax.f32 %v727_v41, 0.0  ;;  %v904_v56 = vmax.f32 %v768_v42, 0.0 }
 0x123   : > { %v809_v43 = vpop.f32.mrf.mxu2  ;;  %v850_v44 = vpop.f32.mrf.mxu3 }
 0x124   : > { %v730_v45 = vpop.f32.mrf.mxu0  ;;  %v771_v46 = vpop.f32.mrf.mxu1  ;;  %v905_v5 = vmax.f32 %v809_v43, 0.0  ;;  %v906_v6 = vmax.f32 %v850_v44, 0.0 }
 0x125   : > { %v907_v51 = vmax.f32 %v730_v45, 0.0  ;;  %v908_v52 = vmax.f32 %v771_v46, 0.0 }
 0x12b   : > { %v812_v47 = vpop.f32.mrf.mxu2  ;;  %v853_v48 = vpop.f32.mrf.mxu3 }
 0x12c   : > { %v733_v49 = vpop.f32.mrf.mxu0  ;;  %v774_v50 = vpop.f32.mrf.mxu1  ;;  %v909_v2 = vmax.f32 %v812_v47, 0.0  ;;  %v910_v3 = vmax.f32 %v853_v48, 0.0  ;;  %v1084_v47 = vld [vmem:[#allocation11] sm:$0xff] }
 0x12d   : > { %v911_v53 = vmax.f32 %v733_v49, 0.0  ;;  %v912_v54 = vmax.f32 %v774_v50, 0.0 }
 0x12f   : > { %947 = vmatpush.msrb.mxu0 %v911_v53  ;;  %979 = vmatpush.msrb.mxu1 %v912_v54 }
 0x131   : > { %948 = vmatpush.msrb.mxu0 %v907_v51  ;;  %980 = vmatpush.msrb.mxu1 %v908_v52 }
 0x133   : > { %v815_v59 = vpop.f32.mrf.mxu2  ;;  %v856_v60 = vpop.f32.mrf.mxu3  ;;  %949 = vmatpush.msrb.mxu0 %v903_v55  ;;  %981 = vmatpush.msrb.mxu1 %v904_v56  ;;  %v1085_v56 = vld [vmem:[#allocation11 + $0x8] sm:$0xff] }
 0x134   : > { %v913_v61 = vmax.f32 %v815_v59, 0.0  ;;  %v914_v62 = vmax.f32 %v856_v60, 0.0 }
 0x135   : > { %950 = vmatpush.msrb.mxu0 %v899_v57  ;;  %982 = vmatpush.msrb.mxu1 %v900_v58 }
 0x136   : > { %1011 = vmatpush.msrb.mxu2 %v913_v61  ;;  %1043 = vmatpush.msrb.mxu3 %v914_v62  ;;  %v1086_v61 = vld [vmem:[#allocation11 + $0x10] sm:$0xff]  ;;  %v1087_v62 = vld [vmem:[#allocation11 + $0x18] sm:$0xff] }
 0x137   : > { %951 = vmatpush.msrb.mxu0 %v895_v63  ;;  %983 = vmatpush.msrb.mxu1 %v896_v1  ;;  %v1088_v63 = vld [vmem:[#allocation11 + $0x20] sm:$0xff] }
 0x138   : > { %1012 = vmatpush.msrb.mxu2 %v909_v2  ;;  %1044 = vmatpush.msrb.mxu3 %v910_v3 }
 0x139   : > { %1656 = vmatmul.msk.f32.vlgmr.msrb.gmra.mxu0 %vm920_vm1, %v915_v4  ;;  %1661 = vmatmul.msk.f32.vlgmr.msrb.gmra.mxu1 %vm920_vm1, %v915_v4 }
 0x13a   : > { %1013 = vmatpush.msrb.mxu2 %v905_v5  ;;  %1045 = vmatpush.msrb.mxu3 %v906_v6 }
 0x13c   : > { %1014 = vmatpush.msrb.mxu2 %v901_v7  ;;  %1046 = vmatpush.msrb.mxu3 %v902_v8 }
 0x13e   : > { %1015 = vmatpush.msrb.mxu2 %v897_v9  ;;  %1047 = vmatpush.msrb.mxu3 %v898_v10 }
 0x13f   : > { %1666 = vmatmul.msk.f32.vlgmr.msrb.gmra.mxu2 %vm920_vm1, %v915_v4  ;;  %1671 = vmatmul.msk.f32.vlgmr.msrb.gmra.mxu3 %vm920_vm1, %v915_v4 }
 0x141   : > { %1657 = vmatmul.msk.f32.gmra.mxu0 %vm920_vm1, %v916_v11  ;;  %1662 = vmatmul.msk.f32.gmra.mxu1 %vm920_vm1, %v916_v11 }
 0x147   : > { %1667 = vmatmul.msk.f32.gmra.mxu2 %vm920_vm1, %v916_v11  ;;  %1672 = vmatmul.msk.f32.gmra.mxu3 %vm920_vm1, %v916_v11 }
 0x149   : > { %1658 = vmatmul.msk.f32.gmra.mxu0 %vm920_vm1, %v917_v12  ;;  %1663 = vmatmul.msk.f32.gmra.mxu1 %vm920_vm1, %v917_v12 }
 0x14f   : > { %1668 = vmatmul.msk.f32.gmra.mxu2 %vm920_vm1, %v917_v12  ;;  %1673 = vmatmul.msk.f32.gmra.mxu3 %vm920_vm1, %v917_v12 }
 0x151   : > { %1659 = vmatmul.msk.f32.gmra.mxu0 %vm920_vm1, %v918_v13  ;;  %1664 = vmatmul.msk.f32.gmra.mxu1 %vm920_vm1, %v918_v13 }
 0x157   : > { %1669 = vmatmul.msk.f32.gmra.mxu2 %vm920_vm1, %v918_v13  ;;  %1674 = vmatmul.msk.f32.gmra.mxu3 %vm920_vm1, %v918_v13 }
 0x159   : > { %1660 = vmatmul.msk.f32.gmra.mxu0 %vm920_vm1, %v919_v14  ;;  %1665 = vmatmul.msk.f32.gmra.mxu1 %vm920_vm1, %v919_v14 }
 0x15f   : > { %1670 = vmatmul.msk.f32.gmra.mxu2 %vm920_vm1, %v919_v14  ;;  %1675 = vmatmul.msk.f32.gmra.mxu3 %vm920_vm1, %v919_v14 }
 0x1b6   : > { %v953_v15 = vpop.f32.mrf.mxu0  ;;  %v985_v16 = vpop.f32.mrf.mxu1 }
 0x1b7   : > { %v1064_v45 = vmax.f32 %v953_v15, 0.0  ;;  %v1065_v46 = vmax.f32 %v985_v16, 0.0 }
 0x1be   : > { %v956_v17 = vpop.f32.mrf.mxu0  ;;  %v988_v18 = vpop.f32.mrf.mxu1 }
 0x1bf   : > { %v1068_v43 = vmax.f32 %v956_v17, 0.0  ;;  %v1069_v44 = vmax.f32 %v988_v18, 0.0 }
 0x1c2   : > { %v1017_v19 = vpop.f32.mrf.mxu2  ;;  %v1049_v20 = vpop.f32.mrf.mxu3 }
 0x1c3   : > { %v1066_v59 = vmax.f32 %v1017_v19, 0.0  ;;  %v1067_v60 = vmax.f32 %v1049_v20, 0.0 }
 0x1c6   : > { %v959_v21 = vpop.f32.mrf.mxu0  ;;  %v991_v22 = vpop.f32.mrf.mxu1 }
 0x1c7   : > { %v1072_v39 = vmax.f32 %v959_v21, 0.0  ;;  %v1073_v40 = vmax.f32 %v991_v22, 0.0 }
 0x1ca   : > { %v1020_v23 = vpop.f32.mrf.mxu2  ;;  %v1052_v24 = vpop.f32.mrf.mxu3 }
 0x1cb   : > { %v1070_v57 = vmax.f32 %v1020_v23, 0.0  ;;  %v1071_v58 = vmax.f32 %v1052_v24, 0.0 }
 0x1ce   : > { %v962_v27 = vpop.f32.mrf.mxu0  ;;  %v994_v28 = vpop.f32.mrf.mxu1 }
 0x1cf   : > { %v1076_v33 = vmax.f32 %v962_v27, 0.0  ;;  %v1077_v34 = vmax.f32 %v994_v28, 0.0 }
 0x1d2   : > { %v1023_v29 = vpop.f32.mrf.mxu2  ;;  %v1055_v30 = vpop.f32.mrf.mxu3 }
 0x1d3   : > { %v1074_v54 = vmax.f32 %v1023_v29, 0.0  ;;  %v1075_v55 = vmax.f32 %v1055_v30, 0.0  ;;  %v1252_v29 = vld [vmem:[#allocation12] sm:$0xff] }
 0x1d6   : > { %v965_v31 = vpop.f32.mrf.mxu0  ;;  %v997_v32 = vpop.f32.mrf.mxu1 }
 0x1d7   : > { %v1080_v37 = vmax.f32 %v965_v31, 0.0  ;;  %v1081_v38 = vmax.f32 %v997_v32, 0.0 }
 0x1d9   : > { %1115 = vmatpush.msra.mxu0 %v1080_v37  ;;  %1147 = vmatpush.msra.mxu1 %v1081_v38 }
 0x1da   : > { %v1026_v41 = vpop.f32.mrf.mxu2  ;;  %v1058_v42 = vpop.f32.mrf.mxu3 }
 0x1db   : > { %1116 = vmatpush.msra.mxu0 %v1076_v33  ;;  %1148 = vmatpush.msra.mxu1 %v1077_v34  ;;  %v1078_v52 = vmax.f32 %v1026_v41, 0.0  ;;  %v1079_v53 = vmax.f32 %v1058_v42, 0.0 }
 0x1dd   : > { %1117 = vmatpush.msra.mxu0 %v1072_v39  ;;  %1149 = vmatpush.msra.mxu1 %v1073_v40 }
 0x1df   : > { %1118 = vmatpush.msra.mxu0 %v1068_v43  ;;  %1150 = vmatpush.msra.mxu1 %v1069_v44 }
 0x1e1   : > { %1119 = vmatpush.msra.mxu0 %v1064_v45  ;;  %1151 = vmatpush.msra.mxu1 %v1065_v46 }
 0x1e2   : > { %v1029_v48 = vpop.f32.mrf.mxu2  ;;  %v1061_v49 = vpop.f32.mrf.mxu3  ;;  %1676 = vmatmul.msk.f32.vlgmr.msra.gmra.mxu0 %vm920_vm1, %v1084_v47  ;;  %1681 = vmatmul.msk.f32.vlgmr.msra.gmra.mxu1 %vm920_vm1, %v1084_v47 }
 0x1e3   : > { %v1082_v50 = vmax.f32 %v1029_v48, 0.0  ;;  %v1083_v51 = vmax.f32 %v1061_v49, 0.0 }
 0x1e5   : > { %1179 = vmatpush.msra.mxu2 %v1082_v50  ;;  %1211 = vmatpush.msra.mxu3 %v1083_v51 }
 0x1e7   : > { %1180 = vmatpush.msra.mxu2 %v1078_v52  ;;  %1212 = vmatpush.msra.mxu3 %v1079_v53 }
 0x1e9   : > { %1181 = vmatpush.msra.mxu2 %v1074_v54  ;;  %1213 = vmatpush.msra.mxu3 %v1075_v55 }
 0x1ea   : > { %1677 = vmatmul.msk.f32.gmra.mxu0 %vm920_vm1, %v1085_v56  ;;  %1682 = vmatmul.msk.f32.gmra.mxu1 %vm920_vm1, %v1085_v56 }
 0x1eb   : > { %1182 = vmatpush.msra.mxu2 %v1070_v57  ;;  %1214 = vmatpush.msra.mxu3 %v1071_v58 }
 0x1ed   : > { %1183 = vmatpush.msra.mxu2 %v1066_v59  ;;  %1215 = vmatpush.msra.mxu3 %v1067_v60 }
 0x1ee   : > { %1686 = vmatmul.msk.f32.vlgmr.msra.gmra.mxu2 %vm920_vm1, %v1084_v47  ;;  %1691 = vmatmul.msk.f32.vlgmr.msra.gmra.mxu3 %vm920_vm1, %v1084_v47 }
 0x1f2   : > { %1678 = vmatmul.msk.f32.gmra.mxu0 %vm920_vm1, %v1086_v61  ;;  %1683 = vmatmul.msk.f32.gmra.mxu1 %vm920_vm1, %v1086_v61 }
 0x1f6   : > { %1687 = vmatmul.msk.f32.gmra.mxu2 %vm920_vm1, %v1085_v56  ;;  %1692 = vmatmul.msk.f32.gmra.mxu3 %vm920_vm1, %v1085_v56 }
 0x1fa   : > { %1679 = vmatmul.msk.f32.gmra.mxu0 %vm920_vm1, %v1087_v62  ;;  %1684 = vmatmul.msk.f32.gmra.mxu1 %vm920_vm1, %v1087_v62 }
 0x1fe   : > { %1688 = vmatmul.msk.f32.gmra.mxu2 %vm920_vm1, %v1086_v61  ;;  %1693 = vmatmul.msk.f32.gmra.mxu3 %vm920_vm1, %v1086_v61 }
 0x202   : > { %1680 = vmatmul.msk.f32.gmra.mxu0 %vm920_vm1, %v1088_v63  ;;  %1685 = vmatmul.msk.f32.gmra.mxu1 %vm920_vm1, %v1088_v63 }
 0x206   : > { %1689 = vmatmul.msk.f32.gmra.mxu2 %vm920_vm1, %v1087_v62  ;;  %1694 = vmatmul.msk.f32.gmra.mxu3 %vm920_vm1, %v1087_v62 }
 0x20e   : > { %1690 = vmatmul.msk.f32.gmra.mxu2 %vm920_vm1, %v1088_v63  ;;  %1695 = vmatmul.msk.f32.gmra.mxu3 %vm920_vm1, %v1088_v63 }
 0x25f   : > { %v1121_v1 = vpop.f32.mrf.mxu0  ;;  %v1153_v2 = vpop.f32.mrf.mxu1 }
 0x260   : > { %v1232_v27 = vmax.f32 %v1121_v1, 0.0  ;;  %v1233_v28 = vmax.f32 %v1153_v2, 0.0 }
 0x267   : > { %v1124_v3 = vpop.f32.mrf.mxu0  ;;  %v1156_v4 = vpop.f32.mrf.mxu1 }
 0x268   : > { %v1236_v23 = vmax.f32 %v1124_v3, 0.0  ;;  %v1237_v24 = vmax.f32 %v1156_v4, 0.0 }
 0x26f   : > { %v1127_v5 = vpop.f32.mrf.mxu0  ;;  %v1159_v6 = vpop.f32.mrf.mxu1 }
 0x270   : > { %v1240_v21 = vmax.f32 %v1127_v5, 0.0  ;;  %v1241_v22 = vmax.f32 %v1159_v6, 0.0 }
 0x271   : > { %v1185_v7 = vpop.f32.mrf.mxu2  ;;  %v1217_v8 = vpop.f32.mrf.mxu3 }
 0x272   : > { %v1234_v44 = vmax.f32 %v1185_v7, 0.0  ;;  %v1235_v45 = vmax.f32 %v1217_v8, 0.0 }
 0x277   : > { %v1130_v9 = vpop.f32.mrf.mxu0  ;;  %v1162_v10 = vpop.f32.mrf.mxu1 }
 0x278   : > { %v1244_v15 = vmax.f32 %v1130_v9, 0.0  ;;  %v1245_v16 = vmax.f32 %v1162_v10, 0.0 }
 0x279   : > { %v1188_v11 = vpop.f32.mrf.mxu2  ;;  %v1220_v12 = vpop.f32.mrf.mxu3 }
 0x27a   : > { %v1238_v42 = vmax.f32 %v1188_v11, 0.0  ;;  %v1239_v43 = vmax.f32 %v1220_v12, 0.0 }
 0x27f   : > { %v1133_v13 = vpop.f32.mrf.mxu0  ;;  %v1165_v14 = vpop.f32.mrf.mxu1 }
 0x280   : > { %v1248_v17 = vmax.f32 %v1133_v13, 0.0  ;;  %v1249_v18 = vmax.f32 %v1165_v14, 0.0 }
 0x281   : > { %v1191_v19 = vpop.f32.mrf.mxu2  ;;  %v1223_v20 = vpop.f32.mrf.mxu3 }
 0x282   : > { %1267 = vmatpush.msrb.mxu0 %v1248_v17  ;;  %1287 = vmatpush.msrb.mxu1 %v1249_v18  ;;  %v1242_v40 = vmax.f32 %v1191_v19, 0.0  ;;  %v1243_v41 = vmax.f32 %v1223_v20, 0.0 }
 0x284   : > { %1268 = vmatpush.msrb.mxu0 %v1244_v15  ;;  %1288 = vmatpush.msrb.mxu1 %v1245_v16 }
 0x286   : > { %1269 = vmatpush.msrb.mxu0 %v1240_v21  ;;  %1289 = vmatpush.msrb.mxu1 %v1241_v22 }
 0x288   : > { %1270 = vmatpush.msrb.mxu0 %v1236_v23  ;;  %1290 = vmatpush.msrb.mxu1 %v1237_v24 }
 0x289   : > { %v1194_v30 = vpop.f32.mrf.mxu2  ;;  %v1226_v31 = vpop.f32.mrf.mxu3 }
 0x28a   : > { %1271 = vmatpush.msrb.mxu0 %v1232_v27  ;;  %1291 = vmatpush.msrb.mxu1 %v1233_v28  ;;  %v1246_v38 = vmax.f32 %v1194_v30, 0.0  ;;  %v1247_v39 = vmax.f32 %v1226_v31, 0.0 }
 0x28b   : > { %1696 = vmatmul.msk.f32.vlgmr.msrb.gmra.mxu0 %vm920_vm1, %v1252_v29  ;;  %1697 = vmatmul.msk.f32.vlgmr.msrb.gmra.mxu1 %vm920_vm1, %v1252_v29 }
 0x291   : > { %v1197_v32 = vpop.f32.mrf.mxu2  ;;  %v1229_v33 = vpop.f32.mrf.mxu3 }
 0x292   : > { %v1250_v34 = vmax.f32 %v1197_v32, 0.0  ;;  %v1251_v37 = vmax.f32 %v1229_v33, 0.0 }
 0x294   : > { %1307 = vmatpush.msrb.mxu2 %v1250_v34  ;;  %1327 = vmatpush.msrb.mxu3 %v1251_v37 }
 0x296   : > { %1308 = vmatpush.msrb.mxu2 %v1246_v38  ;;  %1328 = vmatpush.msrb.mxu3 %v1247_v39 }
 0x298   : > { %1309 = vmatpush.msrb.mxu2 %v1242_v40  ;;  %1329 = vmatpush.msrb.mxu3 %v1243_v41 }
 0x29a   : > { %1310 = vmatpush.msrb.mxu2 %v1238_v42  ;;  %1330 = vmatpush.msrb.mxu3 %v1239_v43 }
 0x29c   : > { %1311 = vmatpush.msrb.mxu2 %v1234_v44  ;;  %1331 = vmatpush.msrb.mxu3 %v1235_v45 }
 0x29d   : > { %1698 = vmatmul.msk.f32.vlgmr.msrb.gmra.mxu2 %vm920_vm1, %v1252_v29  ;;  %1699 = vmatmul.msk.f32.vlgmr.msrb.gmra.mxu3 %vm920_vm1, %v1252_v29 }
 0x308   : > { %v1273_v46 = vpop.f32.mrf.mxu0  ;;  %v1293_v47 = vpop.f32.mrf.mxu1 }
 0x309   : > { %v1340_v48 = vadd.f32 %v2489_v25, %v1273_v46  ;;  %v1341_v49 = vadd.f32 %v2491_v26, %v1293_v47 }
 0x30b   : > { %v1700_v50 = vmul.f32 -1.442695, %v1340_v48  ;;  %v1701_v51 = vmul.f32 -1.442695, %v1341_v49 }
 0x30d   : > { %1857 = vpow2.f32 %v1700_v50 }
 0x30e   : > { %1859 = vpow2.f32 %v1701_v51 }
 0x313   : > { %v1858_v52 = vpop.eup %1857 }
 0x314   : > { %v1860_v53 = vpop.eup %1859  ;;  %v1356_v54 = vadd.f32 1.0, %v1858_v52 }
 0x315   : > { %v1357_v55 = vadd.f32 1.0, %v1860_v53 }
 0x316   : > { %1861 = vrcp.f32 %v1356_v54  ;;  %vm1365_vm3 = vweird.f32 %v1356_v54  ;;  %v1371_v6 = vand.u32 2147483648, %v1356_v54  ;;  %v1369_v10 = vand.u32 2147483647, %v1356_v54 }
 0x317   : > { %1863 = vrcp.f32 %v1357_v55  ;;  %v1386_v62 = vand.u32 2147483648, %v1357_v55  ;;  %v1384_v4 = vand.u32 2147483647, %v1357_v55  ;;  %vm1380_vm6 = vweird.f32 %v1357_v55 }
 0x318   : > { %v1372_v13 = vor.u32 1.1754944e-38, %v1371_v6  ;;  %vm1370_vm10 = vcmp.eq.f32.partialorder %v1369_v10, 8.507059e+37 }
 0x319   : > { %v1387_v12 = vor.u32 1.1754944e-38, %v1386_v62  ;;  %vm1385_vm8 = vcmp.eq.f32.partialorder %v1384_v4, 8.507059e+37 }
 0x31c   : > { %v1862_v56 = vpop.eup %1861 }
 0x31d   : > { %v1864_v57 = vpop.eup %1863  ;;  %v1361_v58 = vmul.f32 %v1862_v56, %v1356_v54  ;;  %vm1366_vm2 = vweird.f32 %v1862_v56 }
 0x31e   : > { %v1376_v59 = vmul.f32 %v1864_v57, %v1357_v55  ;;  %vm1381_vm4 = vweird.f32 %v1864_v57  ;;  %vm2545_vm5 = vmor %vm1365_vm3, %vm1366_vm2  ;;  %vm1429_vm3 = vcmask 1042434  }
 0x31f   : > { %v1362_v60 = vsub.f32 1.0, %v1361_v58  ;;  %vm1382_vm7 = vmor %vm1380_vm6, %vm1381_vm4  ;;  %vm1431_vm4 = vcmask 1041408  }
 0x320   : > { %v1377_v61 = vsub.f32 1.0, %v1376_v59  ;;  %v1313_v25 = vpop.f32.mrf.mxu2  ;;  %v1333_v63 = vpop.f32.mrf.mxu3 }
 0x321   : > { %v1363_v26 = vmul.f32 %v1862_v56, %v1362_v60  ;;  %v1342_v1 = vadd.f32 %v2493_v35, %v1313_v25  ;;  %v1343_v2 = vadd.f32 %v2495_v36, %v1333_v63 }
 0x322   : > { %v1378_v3 = vmul.f32 %v1864_v57, %v1377_v61 }
 0x323   : > { %v1364_v5 = vadd.f32 %v1862_v56, %v1363_v26  ;;  %v1702_v7 = vmul.f32 -1.442695, %v1342_v1  ;;  %v1703_v8 = vmul.f32 -1.442695, %v1343_v2 }
 0x324   : > { %v1379_v11 = vadd.f32 %v1864_v57, %v1378_v3 }
 0x325   : > { %1865 = vpow2.f32 %v1702_v7  ;;  %v1368_v35 = vsel %vm2545_vm5, %v1862_v56, %v1364_v5  ;;  %vm1436_vm5 = vcmp.lt.s32.totalorder %v381_v0, 512 }
 0x326   : > { %1867 = vpow2.f32 %v1703_v8  ;;  %v1383_v36 = vsel %vm1382_vm7, %v1864_v57, %v1379_v11  ;;  %v1373_v16 = vsel %vm1370_vm10, %v1372_v13, %v1368_v35 }
 0x327   : > { %v1388_v14 = vsel %vm1385_vm8, %v1387_v12, %v1383_v36 }
 0x328   : > { %v1424_v15 = vrot.slane %v1388_v14, 7 }
 0x32a   : > { %v1428_v17 = vsel %vm1427_vm9, %v1373_v16, %v1424_v15 }
 0x32b   : > { %v1866_v18 = vpop.eup %1865 }
 0x32c   : > { %v1868_v19 = vpop.eup %1867  ;;  %v1358_v20 = vadd.f32 1.0, %v1866_v18 }
 0x32d   : > { %v1359_v21 = vadd.f32 1.0, %v1868_v19 }
 0x32e   : > { %1869 = vrcp.f32 %v1358_v20  ;;  %v1401_v29 = vand.u32 2147483648, %v1358_v20  ;;  %v1399_v32 = vand.u32 2147483647, %v1358_v20  ;;  %vm1395_vm13 = vweird.f32 %v1358_v20 }
 0x32f   : > { %1871 = vrcp.f32 %v1359_v21  ;;  %v1416_v33 = vand.u32 2147483648, %v1359_v21  ;;  %v1414_v37 = vand.u32 2147483647, %v1359_v21  ;;  %vm1410_vm15 = vweird.f32 %v1359_v21 }
 0x330   : > { %v1402_v39 = vor.u32 1.1754944e-38, %v1401_v29  ;;  %vm1400_vm0 = vcmp.eq.f32.partialorder %v1399_v32, 8.507059e+37 }
 0x331   : > { %v1417_v41 = vor.u32 1.1754944e-38, %v1416_v33  ;;  %vm1415_vm2 = vcmp.eq.f32.partialorder %v1414_v37, 8.507059e+37 }
 0x334   : > { %v1870_v22 = vpop.eup %1869 }
 0x335   : > { %v1872_v23 = vpop.eup %1871  ;;  %v1391_v24 = vmul.f32 %v1870_v22, %v1358_v20  ;;  %vm1396_vm11 = vweird.f32 %v1870_v22 }
 0x336   : > { %v1406_v27 = vmul.f32 %v1872_v23, %v1359_v21  ;;  %vm1411_vm12 = vweird.f32 %v1872_v23  ;;  %vm1397_vm14 = vmor %vm1395_vm13, %vm1396_vm11 }
 0x337   : > { %v1392_v28 = vsub.f32 1.0, %v1391_v24  ;;  %vm1412_vm1 = vmor %vm1410_vm15, %vm1411_vm12 }
 0x338   : > { %v1407_v30 = vsub.f32 1.0, %v1406_v27 }
 0x339   : > { %v1393_v31 = vmul.f32 %v1870_v22, %v1392_v28 }
 0x33a   : > { %v1408_v34 = vmul.f32 %v1872_v23, %v1407_v30 }
 0x33b   : > { %v1394_v38 = vadd.f32 %v1870_v22, %v1393_v31 }
 0x33c   : > { %v1409_v40 = vadd.f32 %v1872_v23, %v1408_v34 }
 0x33d   : > { %v1398_v42 = vsel %vm1397_vm14, %v1870_v22, %v1394_v38 }
 0x33e   : > { %v1403_v43 = vsel %vm1400_vm0, %v1402_v39, %v1398_v42  ;;  %v1413_v44 = vsel %vm1412_vm1, %v1872_v23, %v1409_v40 }
 0x33f   : > { %v1418_v45 = vsel %vm1415_vm2, %v1417_v41, %v1413_v44  ;;  %v1425_v46 = vrot.slane %v1403_v43, 6 }
 0x340   : > { %v1426_v47 = vrot.slane %v1418_v45, 5 }
 0x342   : > { %v1430_v48 = vsel %vm1429_vm3, %v1425_v46, %v1426_v47 }
 0x343   : > { %v1432_v49 = vsel %vm1431_vm4, %v1428_v17, %v1430_v48 }
 0x344   : > { %1438 = vst.msk [vmem:[%s373_s28] sm:$0xf] %vm1436_vm5, %v1432_v49 }
 0x345   : > { %2080 = shalt.err (!%p2077_p10)
}
 0x346   : > { %1782 = dma.vmem_to_hbm [thread:$0]  (%p2266_p4), %s1453_s19, 64, %s1455_s14, %s1440_s26  }
 0x347 PF: > { %s1466_s2 = sand.u32 1, %s2123_s21   ;;  %p2611_p11 = scmp.ge.s32.totalorder %s2135_s24, 2 }
 0x348   : > { %s1467_s27 = scalar_lea.sflag [#allocation5], %s1466_s2 }
 0x349   : > { %p1805_p5 = pnand %p2611_p11, %p2270_p6 }
 0x34b   : > { %p1806_p13 = pneg %p1805_p5 }
 0x34d   : > { %2118 = dma.done.wait (%p1806_p13), %s1467_s27, 64  }
 0x34e   : > { %2120 = vsyncadd (%p1806_p13), %s1467_s27, 4294967232  ;;  %s2612_s5 = sld [smem:[#allocation21_spill]]  ;;  %p24_p0 = scmp.ge.s32.totalorder %s2240_s9, 4  }
 0x34f   : > { %s2613_s21 = smov %s2127_s22  ;;  %s2614_s22 = smov %s2131_s23 }
 0x350   : > { %s2616_s24 = smov %s2240_s9  ;;  %26 = sbr.rel (!%p24_p0) target bundleno = 14 (0xe), region = 118 }
 0x354   : > { %s2615_s23 = smov %s2612_s5 }
 0x355   :  { %1473 = vsyncpa [#allocation4], 1 }
 0x356   :  { %1475 = vsyncpa [#allocation4 + $0x1], 1 }
 0x357   :  { %1476 = vsyncpa [#allocation7], 1 }
 0x358   :  { %1478 = vsyncpa [#allocation7 + $0x1], 1 }
 0x359   :  { %1479 = vsyncpa [#allocation10], 1 }
 0x35a   :  { %1480 = vsyncpa [#allocation13], 1 }
 0x35b   :  { %1481 = vsyncpa [#allocation5], 1 }
 0x35c   :  { %1483 = vsyncpa [#allocation5 + $0x1], 1 }

</bundles_post_ra>
